<compile_context>
chip_gen: v7x
topology: tpu7x:2x2x1
jax: 0.10.0
libtpu: 0.0.40
codegen_flags: <defaults>
</compile_context>

<pallas_src>
import jax
import jax.numpy as jnp
from jax.experimental import pallas as pl
from jax.experimental.pallas import tpu as pltpu

# ----------------------------- model hyper-params -----------------------------
VOCAB = 64          # vocab_size
HIDDEN = 32         # hidden_dim
EMBED = 32          # embed_dim
NUM_LAYERS = 2      # num_layers
MLP_DIM = 2048      # nn.Linear(hidden_dim, 2048)
BATCH = 2
ENC_LEN = 8         # max_pr_len
VOCAB_PAD = 128     # lane-dense logits width (multiple of 128)
MAX_LEN = 16        # TODO(synk): Constants.MAX_LEN is not given; using 16.


def _vmem_spec():
    return pl.BlockSpec(memory_space=pltpu.MemorySpace.VMEM)


def _resident_spec(shape):
    """Full-array block whose index_map is constant in t -> DMA'd exactly once."""
    nd = len(shape)
    return pl.BlockSpec(shape, lambda t, _nd=nd: (0,) * _nd)


# ============================ shared per-step compute ==========================
def _decoder_step(tok_col, emb, w_l0, b_l0, w_l1, b_l1,
                  h0, c0, h1, c1, enc, w_fused, b1, w2, b2):
    """One decoder step on VMEM-resident values.

    Returns (padded logits (B, VOCAB_PAD) f32, ((h0,c0),(h1,c1)))."""
    B = tok_col.shape[0]
    V = emb.shape[0]
    H = HIDDEN

    # Embedding lookup: single-shot one-hot(ids) @ emb (exact row copy).
    onehot = (jax.lax.broadcasted_iota(jnp.int32, (B, V), 1)
              == tok_col).astype(jnp.float32)                          # (B, V)
    x = jnp.dot(onehot, emb, preferred_element_type=jnp.float32)       # (B, E)

    # Two-layer LSTM step (inter-layer dropout p=0.1 is a no-op at inference).
    states = []
    for (w, b, h_prev, c_prev) in ((w_l0, b_l0, h0, c0), (w_l1, b_l1, h1, c1)):
        xh = jnp.concatenate([x, h_prev], axis=1)                      # (B, in+H)
        gates = jnp.dot(xh, w, preferred_element_type=jnp.float32) + b # (B, 4H)
        lane = jax.lax.broadcasted_iota(jnp.int32, gates.shape, 1)
        is_g = (lane >= 2 * H) & (lane < 3 * H)
        # Full-width EUP passes over the lane-dense 128-wide gates vreg.
        act = jnp.where(is_g, jnp.tanh(gates), jax.nn.sigmoid(gates))
        i = act[:, 0:H]
        f = act[:, H:2 * H]
        g = act[:, 2 * H:3 * H]
        o = act[:, 3 * H:4 * H]
        c_new = f * c_prev + i * g
        h_new = o * jnp.tanh(c_new)
        states.append((h_new, c_new))
        x = h_new
    out = x                                                            # (B, H)

    # Attention over the encoder memory.
    # TODO(synk): Attention(hidden_dim) definition is not provided; assuming
    # unparameterized Luong dot-product softmax attention, no length masking.
    scores = jnp.sum(enc * out[:, None, :], axis=-1)                   # (B, L)
    scores = scores - jnp.max(scores, axis=-1, keepdims=True)
    e = jnp.exp(scores)
    attn = e / jnp.sum(e, axis=-1, keepdims=True)
    context = jnp.sum(attn[:, :, None] * enc, axis=1)                  # (B, H)

    # wc folded into MLP layer 1: h1 = cat(context, out) @ (wc^T @ w1^T) + b1
    cat = jnp.concatenate([context, out], axis=1)                      # (B, 2H)
    h1m = jnp.dot(cat.astype(jnp.bfloat16), w_fused,
                  preferred_element_type=jnp.float32) + b1             # (B, MLP)
    h1m = jnp.maximum(h1m, 0.0)
    logits = jnp.dot(h1m.astype(jnp.bfloat16), w2,
                     preferred_element_type=jnp.float32) + b2          # (B, VPAD)
    return logits, states


# =========================== single-step forward kernel =======================
def _forward_kernel(tok_ref, state_ref, emb_ref, w_l0_ref, b_l0_ref,
                    w_l1_ref, b_l1_ref, enc_ref, wf_ref, b1_ref,
                    w2_ref, b2_ref, logits_ref, state_out_ref):
    H = HIDDEN
    s = state_ref[...]                          # packed [h0 | h1 | c0 | c1]
    h0_in = s[:, 0:H]
    h1_in = s[:, H:2 * H]
    c0_in = s[:, 2 * H:3 * H]
    c1_in = s[:, 3 * H:4 * H]

    logits, ((h0, c0), (h1, c1)) = _decoder_step(
        tok_ref[...], emb_ref[...], w_l0_ref[...], b_l0_ref[...],
        w_l1_ref[...], b_l1_ref[...],
        h0_in, c0_in, h1_in, c1_in,
        enc_ref[...], wf_ref[...], b1_ref[...], w2_ref[...], b2_ref[...])

    logits_ref[...] = logits
    state_out_ref[...] = jnp.concatenate([h0, h1, c0, c1], axis=1)


# ==================== fused multi-step greedy decode kernel ===================
def _predict_kernel(state0_ref, emb_ref, w_l0_ref, b_l0_ref, w_l1_ref, b_l1_ref,
                    enc_ref, wf_ref, b1_ref, w2_ref, b2_ref,
                    logits_ref,
                    h0_sc, c0_sc, h1_sc, c1_sc, tok_sc):
    H = HIDDEN
    t = pl.program_id(0)

    @pl.when(t == 0)
    def _init():
        s = state0_ref[...]
        h0_sc[...] = s[:, 0:H]
        h1_sc[...] = s[:, H:2 * H]
        c0_sc[...] = s[:, 2 * H:3 * H]
        c1_sc[...] = s[:, 3 * H:4 * H]
        tok_sc[...] = jnp.zeros_like(tok_sc)    # predict() starts from token 0

    logits, ((h0, c0), (h1, c1)) = _decoder_step(
        tok_sc[...], emb_ref[...], w_l0_ref[...], b_l0_ref[...],
        w_l1_ref[...], b_l1_ref[...],
        h0_sc[...], c0_sc[...], h1_sc[...], c1_sc[...],
        enc_ref[...], wf_ref[...], b1_ref[...], w2_ref[...], b2_ref[...])

    logits_ref[0] = logits
    h0_sc[...] = h0
    c0_sc[...] = c0
    h1_sc[...] = h1
    c1_sc[...] = c1

    # Greedy argmax over the true vocab (padded lanes masked to -inf), fed back
    # as the next step's input token (first-max tie-break, like torch.argmax).
    lane = jax.lax.broadcasted_iota(jnp.int32, logits.shape, 1)
    masked = jnp.where(lane < VOCAB, logits, -jnp.inf)
    m = jnp.max(masked, axis=-1, keepdims=True)
    idx = jnp.min(jnp.where(masked == m, lane.astype(jnp.float32),
                            float(VOCAB_PAD)), axis=-1, keepdims=True)
    tok_sc[...] = idx.astype(jnp.int32)


# ================================= cost hints =================================
def _flops_per_step(B):
    return 2 * B * (VOCAB * EMBED
                    + (EMBED + HIDDEN) * 4 * HIDDEN
                    + 2 * HIDDEN * 4 * HIDDEN
                    + 2 * ENC_LEN * HIDDEN
                    + 2 * HIDDEN * MLP_DIM
                    + MLP_DIM * VOCAB_PAD)


def _weight_bytes():
    return (VOCAB * EMBED * 4
            + (EMBED + HIDDEN) * 4 * HIDDEN * 4 + 4 * HIDDEN * 4
            + 2 * HIDDEN * 4 * HIDDEN * 4 + 4 * HIDDEN * 4
            + 2 * HIDDEN * MLP_DIM * 2 + MLP_DIM * 4
            + MLP_DIM * VOCAB_PAD * 2 + VOCAB_PAD * 4
            + BATCH * ENC_LEN * HIDDEN * 4)


# ================================ python wrappers ==============================
def decoder_forward(kparams, input_ids, batch_enc, batch_h, batch_c):
    """Single decoder step (== PyTorch Decoder.forward).

    input_ids: (B, 1) int32
    batch_enc: (B, L, H) f32
    batch_h, batch_c: (num_layers, B, H) f32
    returns (logits (B, V), h (num_layers, B, H), c (num_layers, B, H))."""
    B = input_ids.shape[0]
    H = HIDDEN
    tok = input_ids.reshape(B, 1).astype(jnp.int32)
    # Packed lane-dense state slab [h0 | h1 | c0 | c1] -> (B, 128)
    state_in = jnp.concatenate(
        [batch_h[0], batch_h[1], batch_c[0], batch_c[1]], axis=1)

    logits_pad, state_out = pl.pallas_call(
        _forward_kernel,
        out_shape=(jax.ShapeDtypeStruct((B, VOCAB_PAD), jnp.float32),
                   jax.ShapeDtypeStruct((B, 4 * H), jnp.float32)),
        in_specs=[_vmem_spec()] * 12,
        out_specs=(_vmem_spec(), _vmem_spec()),
        input_output_aliases={1: 1},        # packed state in -> packed state out
        cost_estimate=pl.CostEstimate(
            flops=_flops_per_step(B),
            transcendentals=12 * B * H,
            bytes_accessed=_weight_bytes()),
    )(tok, state_in, kparams["emb"],
      kparams["w_l0"], kparams["b_l0"], kparams["w_l1"], kparams["b_l1"],
      batch_enc, kparams["w_fused"], kparams["mb1"],
      kparams["mw2"], kparams["mb2"])

    logits = logits_pad[:, :VOCAB]
    h = jnp.stack([state_out[:, 0:H], state_out[:, H:2 * H]], axis=0)
    c = jnp.stack([state_out[:, 2 * H:3 * H], state_out[:, 3 * H:4 * H]], axis=0)
    return logits, h, c


def decoder_predict(kparams, batch_enc, batch_h, batch_c, max_len=MAX_LEN):
    """Fused greedy decode (== PyTorch Decoder.predict) in ONE pallas_call.

    Weights / enc stay VMEM-resident across all decode steps; recurrent state
    and the current token live in VMEM scratch."""
    B = batch_enc.shape[0]
    H = HIDDEN
    state_in = jnp.concatenate(
        [batch_h[0], batch_h[1], batch_c[0], batch_c[1]], axis=1)

    operands = (state_in, kparams["emb"],
                kparams["w_l0"], kparams["b_l0"],
                kparams["w_l1"], kparams["b_l1"],
                batch_enc, kparams["w_fused"], kparams["mb1"],
                kparams["mw2"], kparams["mb2"])
    in_specs = [_resident_spec(op.shape) for op in operands]

    step_logits = pl.pallas_call(
        _predict_kernel,
        out_shape=jax.ShapeDtypeStruct((max_len, B, VOCAB_PAD), jnp.float32),
        grid=(max_len,),
        in_specs=in_specs,
        out_specs=pl.BlockSpec((1, B, VOCAB_PAD), lambda t: (t, 0, 0)),
        scratch_shapes=[pltpu.VMEM((B, H), jnp.float32)] * 4
                       + [pltpu.VMEM((B, 1), jnp.int32)],
        compiler_params=pltpu.CompilerParams(
            dimension_semantics=("arbitrary",)),      # sequential time axis
        cost_estimate=pl.CostEstimate(
            flops=max_len * _flops_per_step(B),
            transcendentals=max_len * 12 * B * H,
            bytes_accessed=_weight_bytes() + max_len * B * VOCAB_PAD * 4),
    )(*operands)

    tokens = jnp.argmax(step_logits[:, :, :VOCAB], axis=-1).astype(jnp.int32)
    return tokens.T, step_logits[:, :, :VOCAB]        # (B, T), (T, B, V)


# ============================ parameter construction ==========================
def init_params(key):
    """PyTorch-layout parameters (same layout as nn.LSTM / nn.Linear)."""
    ks = jax.random.split(key, 6 + 4 * NUM_LAYERS)
    s = 0.1
    p = {}
    emb = s * jax.random.normal(ks[0], (VOCAB, EMBED), jnp.float32)
    p["emb"] = emb.at[1].set(0.0)                      # padding_idx=1
    for l in range(NUM_LAYERS):
        in_dim = EMBED if l == 0 else HIDDEN
        base = 1 + 4 * l
        p[f"w_ih_{l}"] = s * jax.random.normal(ks[base + 0], (4 * HIDDEN, in_dim), jnp.float32)
        p[f"w_hh_{l}"] = s * jax.random.normal(ks[base + 1], (4 * HIDDEN, HIDDEN), jnp.float32)
        p[f"b_ih_{l}"] = s * jax.random.normal(ks[base + 2], (1, 4 * HIDDEN), jnp.float32)
        p[f"b_hh_{l}"] = s * jax.random.normal(ks[base + 3], (1, 4 * HIDDEN), jnp.float32)
    off = 1 + 4 * NUM_LAYERS
    p["wc_w"] = s * jax.random.normal(ks[off + 0], (HIDDEN, 2 * HIDDEN), jnp.float32)
    p["w1"] = s * jax.random.normal(ks[off + 1], (MLP_DIM, HIDDEN), jnp.float32)
    p["b1"] = s * jax.random.normal(ks[off + 2], (1, MLP_DIM), jnp.float32)
    p["w2"] = s * jax.random.normal(ks[off + 3], (VOCAB, MLP_DIM), jnp.float32)
    p["b2"] = s * jax.random.normal(ks[off + 4], (1, VOCAB), jnp.float32)
    return p


def prepare_kernel_params(p):
    """Host-side weight re-layout: transpose / concat / fuse / pad / bf16 once."""
    kp = {"emb": p["emb"]}
    for l in range(NUM_LAYERS):
        kp[f"w_l{l}"] = jnp.concatenate([p[f"w_ih_{l}"].T, p[f"w_hh_{l}"].T], axis=0)
        kp[f"b_l{l}"] = p[f"b_ih_{l}"] + p[f"b_hh_{l}"]
    # wc folded into MLP layer 1: (2H, MLP) bf16
    kp["w_fused"] = (p["wc_w"].T @ p["w1"].T).astype(jnp.bfloat16)
    kp["mb1"] = p["b1"]                                              # (1, MLP)
    kp["mw2"] = jnp.pad(p["w2"].T,
                        ((0, 0), (0, VOCAB_PAD - VOCAB))).astype(jnp.bfloat16)
    kp["mb2"] = jnp.pad(p["b2"], ((0, 0), (0, VOCAB_PAD - VOCAB)))
    return kp


# ========================= pure-JAX references (checks) ========================
def _ref_step_f32(p, tok, enc, hs, cs):
    """True f32 PyTorch semantics for one decoder step."""
    x = p["emb"][tok]
    new_h, new_c = [], []
    for l in range(NUM_LAYERS):
        gates = (x @ p[f"w_ih_{l}"].T + hs[l] @ p[f"w_hh_{l}"].T
                 + p[f"b_ih_{l}"] + p[f"b_hh_{l}"])
        i = jax.nn.sigmoid(gates[:, 0:HIDDEN])
        f = jax.nn.sigmoid(gates[:, HIDDEN:2 * HIDDEN])
        g = jnp.tanh(gates[:, 2 * HIDDEN:3 * HIDDEN])
        o = jax.nn.sigmoid(gates[:, 3 * HIDDEN:4 * HIDDEN])
        c_new = f * cs[l] + i * g
        h_new = o * jnp.tanh(c_new)
        new_h.append(h_new)
        new_c.append(c_new)
        x = h_new
    out = x
    scores = jnp.einsum("blh,bh->bl", enc, out)
    attn = jax.nn.softmax(scores, axis=-1)
    context = jnp.einsum("bl,blh->bh", attn, enc)
    cat = jnp.concatenate([context, out], axis=1)
    wc_val = cat @ p["wc_w"].T
    h1 = jnp.maximum(wc_val @ p["w1"].T + p["b1"], 0.0)
    logits = h1 @ p["w2"].T + p["b2"]
    return logits, new_h, new_c


def _ref_step_mirrored(kp, tok, enc, hs, cs):
    """Same math as the kernel (fused wc+w1, bf16 MLP weights), pure JAX."""
    x = kp["emb"][tok]
    new_h, new_c = [], []
    for l in range(NUM_LAYERS):
        gates = jnp.concatenate([x, hs[l]], axis=1) @ kp[f"w_l{l}"] + kp[f"b_l{l}"]
        i = jax.nn.sigmoid(gates[:, 0:HIDDEN])
        f = jax.nn.sigmoid(gates[:, HIDDEN:2 * HIDDEN])
        g = jnp.tanh(gates[:, 2 * HIDDEN:3 * HIDDEN])
        o = jax.nn.sigmoid(gates[:, 3 * HIDDEN:4 * HIDDEN])
        c_new = f * cs[l] + i * g
        h_new = o * jnp.tanh(c_new)
        new_h.append(h_new)
        new_c.append(c_new)
        x = h_new
    out = x
    scores = jnp.einsum("blh,bh->bl", enc, out)
    attn = jax.nn.softmax(scores, axis=-1)
    context = jnp.einsum("bl,blh->bh", attn, enc)
    cat = jnp.concatenate([context, out], axis=1)
    h1 = jnp.dot(cat.astype(jnp.bfloat16), kp["w_fused"],
                 preferred_element_type=jnp.float32) + kp["mb1"]
    h1 = jnp.maximum(h1, 0.0)
    logits = jnp.dot(h1.astype(jnp.bfloat16), kp["mw2"],
                     preferred_element_type=jnp.float32) + kp["mb2"]
    return logits[:, :VOCAB], new_h, new_c


# ===================================== main ====================================
if __name__ == "__main__":
    key = jax.random.PRNGKey(0)
    kparam_key, k1, k2, k3, k4 = jax.random.split(key, 5)

    raw_params = init_params(kparam_key)
    kern_params = prepare_kernel_params(raw_params)

    input_ids = jax.random.randint(k1, (BATCH, 1), 0, VOCAB, dtype=jnp.int32)
    batch_enc = jax.random.normal(k2, (BATCH, ENC_LEN, HIDDEN), jnp.float32)
    batch_h = jax.random.normal(k3, (NUM_LAYERS, BATCH, HIDDEN), jnp.float32)
    batch_c = jax.random.normal(k4, (NUM_LAYERS, BATCH, HIDDEN), jnp.float32)

    # ---------------- single-step forward (nn.Module.forward) ----------------
    logits, h, c = decoder_forward(kern_params, input_ids, batch_enc,
                                   batch_h, batch_c)
    jax.block_until_ready((logits, h, c))

    assert logits.shape == (BATCH, VOCAB)
    assert h.shape == (NUM_LAYERS, BATCH, HIDDEN)
    assert c.shape == (NUM_LAYERS, BATCH, HIDDEN)

    hs0 = [batch_h[0], batch_h[1]]
    cs0 = [batch_c[0], batch_c[1]]

    # Tight check against the kernel's exact math (fused wc + bf16 MLP).
    mlog, mh, mc = _ref_step_mirrored(kern_params, input_ids[:, 0],
                                      batch_enc, hs0, cs0)
    assert jnp.allclose(logits, mlog, atol=5e-3, rtol=5e-3)
    assert jnp.allclose(h, jnp.stack(mh, 0), atol=5e-4, rtol=5e-4)
    assert jnp.allclose(c, jnp.stack(mc, 0), atol=5e-4, rtol=5e-4)

    # Looser check against the true f32 PyTorch semantics.
    flog, fh, fc = _ref_step_f32(raw_params, input_ids[:, 0],
                                 batch_enc, hs0, cs0)
    assert jnp.allclose(logits, flog, atol=8e-2, rtol=5e-2)
    assert jnp.allclose(h, jnp.stack(fh, 0), atol=2e-3, rtol=2e-3)
    assert jnp.allclose(c, jnp.stack(fc, 0), atol=2e-3, rtol=2e-3)

    # ------------- fused multi-step greedy decode (nn.Module.predict) --------
    tokens, step_logits = decoder_predict(kern_params, batch_enc,
                                          batch_h, batch_c)
    jax.block_until_ready((tokens, step_logits))
    assert tokens.shape == (BATCH, MAX_LEN)
    assert step_logits.shape == (MAX_LEN, BATCH, VOCAB)

    # Validate the in-kernel recurrence by teacher-forcing the kernel's own
    # token sequence through the mirrored pure-JAX step.
    hs, cs = hs0, cs0
    inp = jnp.zeros((BATCH,), jnp.int32)         # predict() starts from token 0
    for t in range(MAX_LEN):
        rlog, hs, cs = _ref_step_mirrored(kern_params, inp, batch_enc, hs, cs)
        assert jnp.allclose(step_logits[t], rlog, atol=2e-2, rtol=2e-2), t
        inp = tokens[:, t]

    print("KERNEL_OK")
</pallas_src>

<mosaic_0001>
module attributes {stable_mosaic.version = 11 : i64} {
  func.func @_forward_kernel(%arg0: memref<2x1xi32, #tpu.memory_space<vmem>>, %arg1: memref<2x128xf32, #tpu.memory_space<vmem>>, %arg2: memref<64x32xf32, #tpu.memory_space<vmem>>, %arg3: memref<64x128xf32, #tpu.memory_space<vmem>>, %arg4: memref<1x128xf32, #tpu.memory_space<vmem>>, %arg5: memref<64x128xf32, #tpu.memory_space<vmem>>, %arg6: memref<1x128xf32, #tpu.memory_space<vmem>>, %arg7: memref<2x8x32xf32, #tpu.memory_space<vmem>>, %arg8: memref<64x2048xbf16, #tpu.memory_space<vmem>>, %arg9: memref<1x2048xf32, #tpu.memory_space<vmem>>, %arg10: memref<2048x128xbf16, #tpu.memory_space<vmem>>, %arg11: memref<1x128xf32, #tpu.memory_space<vmem>>, %arg12: memref<2x128xf32, #tpu.memory_space<vmem>>, %arg13: memref<2x128xf32, #tpu.memory_space<vmem>>) attributes {dimension_semantics = [], scalar_prefetch = 0 : i64, scratch_operands = 0 : i64, tpu.core_type = #tpu.core_type<tc>} {
    %c0 = arith.constant 0 : index
    %c0_0 = arith.constant 0 : index
    %0 = vector.load %arg1[%c0, %c0_0] : memref<2x128xf32, #tpu.memory_space<vmem>>, vector<2x128xf32>
    %1 = vector.extract_strided_slice %0 {offsets = [0, 0], sizes = [2, 32], strides = [1, 1]} : vector<2x128xf32> to vector<2x32xf32>
    %2 = vector.extract_strided_slice %0 {offsets = [0, 32], sizes = [2, 32], strides = [1, 1]} : vector<2x128xf32> to vector<2x32xf32>
    %3 = vector.extract_strided_slice %0 {offsets = [0, 64], sizes = [2, 32], strides = [1, 1]} : vector<2x128xf32> to vector<2x32xf32>
    %4 = vector.extract_strided_slice %0 {offsets = [0, 96], sizes = [2, 32], strides = [1, 1]} : vector<2x128xf32> to vector<2x32xf32>
    %c0_1 = arith.constant 0 : index
    %c0_2 = arith.constant 0 : index
    %5 = vector.load %arg0[%c0_1, %c0_2] : memref<2x1xi32, #tpu.memory_space<vmem>>, vector<2x1xi32>
    %c0_3 = arith.constant 0 : index
    %c0_4 = arith.constant 0 : index
    %6 = vector.load %arg2[%c0_3, %c0_4] : memref<64x32xf32, #tpu.memory_space<vmem>>, vector<64x32xf32>
    %c0_5 = arith.constant 0 : index
    %c0_6 = arith.constant 0 : index
    %7 = vector.load %arg3[%c0_5, %c0_6] : memref<64x128xf32, #tpu.memory_space<vmem>>, vector<64x128xf32>
    %c0_7 = arith.constant 0 : index
    %c0_8 = arith.constant 0 : index
    %8 = vector.load %arg4[%c0_7, %c0_8] : memref<1x128xf32, #tpu.memory_space<vmem>>, vector<1x128xf32>
    %c0_9 = arith.constant 0 : index
    %c0_10 = arith.constant 0 : index
    %9 = vector.load %arg5[%c0_9, %c0_10] : memref<64x128xf32, #tpu.memory_space<vmem>>, vector<64x128xf32>
    %c0_11 = arith.constant 0 : index
    %c0_12 = arith.constant 0 : index
    %10 = vector.load %arg6[%c0_11, %c0_12] : memref<1x128xf32, #tpu.memory_space<vmem>>, vector<1x128xf32>
    %c0_13 = arith.constant 0 : index
    %c0_14 = arith.constant 0 : index
    %c0_15 = arith.constant 0 : index
    %11 = vector.load %arg7[%c0_13, %c0_14, %c0_15] : memref<2x8x32xf32, #tpu.memory_space<vmem>>, vector<2x8x32xf32>
    %c0_16 = arith.constant 0 : index
    %c0_17 = arith.constant 0 : index
    %12 = vector.load %arg8[%c0_16, %c0_17] : memref<64x2048xbf16, #tpu.memory_space<vmem>>, vector<64x2048xbf16>
    %c0_18 = arith.constant 0 : index
    %c0_19 = arith.constant 0 : index
    %13 = vector.load %arg9[%c0_18, %c0_19] : memref<1x2048xf32, #tpu.memory_space<vmem>>, vector<1x2048xf32>
    %c0_20 = arith.constant 0 : index
    %c0_21 = arith.constant 0 : index
    %14 = vector.load %arg10[%c0_20, %c0_21] : memref<2048x128xbf16, #tpu.memory_space<vmem>>, vector<2048x128xbf16>
    %c0_22 = arith.constant 0 : index
    %c0_23 = arith.constant 0 : index
    %15 = vector.load %arg11[%c0_22, %c0_23] : memref<1x128xf32, #tpu.memory_space<vmem>>, vector<1x128xf32>
    %16 = tpu.iota {dimensions = array<i32: 1>} : vector<2x64xi32>
    %17 = vector.broadcast %5 : vector<2x1xi32> to vector<2x64xi32>
    %18 = arith.cmpi eq, %16, %17 : vector<2x64xi32>
    %19 = arith.extui %18 : vector<2x64xi1> to vector<2x64xi32>
    %20 = arith.sitofp %19 : vector<2x64xi32> to vector<2x64xf32>
    %cst = arith.constant dense<0.000000e+00> : vector<2x32xf32>
    %21 = tpu.matmul %20, %6, %cst {dimension_numbers = #tpu.dot_dimension_numbers<[1], [0], [0], [1], [0, 0, 1, 1], [], []>} : vector<2x64xf32>, vector<64x32xf32>, vector<2x32xf32> -> vector<2x32xf32>
    %22 = tpu.concatenate %21, %1 in 1 : vector<2x32xf32>, vector<2x32xf32> -> vector<2x64xf32>
    %cst_24 = arith.constant dense<0.000000e+00> : vector<2x128xf32>
    %23 = tpu.matmul %22, %7, %cst_24 {dimension_numbers = #tpu.dot_dimension_numbers<[1], [0], [0], [1], [0, 0, 1, 1], [], []>} : vector<2x64xf32>, vector<64x128xf32>, vector<2x128xf32> -> vector<2x128xf32>
    %24 = vector.broadcast %8 : vector<1x128xf32> to vector<2x128xf32>
    %25 = arith.addf %23, %24 : vector<2x128xf32>
    %26 = tpu.iota {dimensions = array<i32: 1>} : vector<2x128xi32>
    %c64_i32 = arith.constant 64 : i32
    %27 = vector.broadcast %c64_i32 : i32 to vector<2x128xi32>
    %28 = arith.cmpi sge, %26, %27 : vector<2x128xi32>
    %c96_i32 = arith.constant 96 : i32
    %29 = vector.broadcast %c96_i32 : i32 to vector<2x128xi32>
    %30 = arith.cmpi slt, %26, %29 : vector<2x128xi32>
    %31 = arith.andi %28, %30 : vector<2x128xi1>
    %32 = math.tanh %25 : vector<2x128xf32>
    %33 = arith.negf %25 : vector<2x128xf32>
    %34 = math.exp %33 : vector<2x128xf32>
    %cst_25 = arith.constant 1.000000e+00 : f32
    %35 = vector.broadcast %cst_25 : f32 to vector<2x128xf32>
    %36 = arith.addf %35, %34 : vector<2x128xf32>
    %37 = arith.divf %35, %36 : vector<2x128xf32>
    %38 = arith.select %31, %32, %37 : vector<2x128xi1>, vector<2x128xf32>
    %39 = vector.extract_strided_slice %38 {offsets = [0, 0], sizes = [2, 32], strides = [1, 1]} : vector<2x128xf32> to vector<2x32xf32>
    %40 = vector.extract_strided_slice %38 {offsets = [0, 32], sizes = [2, 32], strides = [1, 1]} : vector<2x128xf32> to vector<2x32xf32>
    %41 = vector.extract_strided_slice %38 {offsets = [0, 64], sizes = [2, 32], strides = [1, 1]} : vector<2x128xf32> to vector<2x32xf32>
    %42 = vector.extract_strided_slice %38 {offsets = [0, 96], sizes = [2, 32], strides = [1, 1]} : vector<2x128xf32> to vector<2x32xf32>
    %43 = arith.mulf %40, %3 : vector<2x32xf32>
    %44 = arith.mulf %39, %41 : vector<2x32xf32>
    %45 = arith.addf %43, %44 : vector<2x32xf32>
    %46 = math.tanh %45 : vector<2x32xf32>
    %47 = arith.mulf %42, %46 : vector<2x32xf32>
    %48 = tpu.concatenate %47, %2 in 1 : vector<2x32xf32>, vector<2x32xf32> -> vector<2x64xf32>
    %cst_26 = arith.constant dense<0.000000e+00> : vector<2x128xf32>
    %49 = tpu.matmul %48, %9, %cst_26 {dimension_numbers = #tpu.dot_dimension_numbers<[1], [0], [0], [1], [0, 0, 1, 1], [], []>} : vector<2x64xf32>, vector<64x128xf32>, vector<2x128xf32> -> vector<2x128xf32>
    %50 = vector.broadcast %10 : vector<1x128xf32> to vector<2x128xf32>
    %51 = arith.addf %49, %50 : vector<2x128xf32>
    %52 = tpu.iota {dimensions = array<i32: 1>} : vector<2x128xi32>
    %c64_i32_27 = arith.constant 64 : i32
    %53 = vector.broadcast %c64_i32_27 : i32 to vector<2x128xi32>
    %54 = arith.cmpi sge, %52, %53 : vector<2x128xi32>
    %c96_i32_28 = arith.constant 96 : i32
    %55 = vector.broadcast %c96_i32_28 : i32 to vector<2x128xi32>
    %56 = arith.cmpi slt, %52, %55 : vector<2x128xi32>
    %57 = arith.andi %54, %56 : vector<2x128xi1>
    %58 = math.tanh %51 : vector<2x128xf32>
    %59 = arith.negf %51 : vector<2x128xf32>
    %60 = math.exp %59 : vector<2x128xf32>
    %cst_29 = arith.constant 1.000000e+00 : f32
    %61 = vector.broadcast %cst_29 : f32 to vector<2x128xf32>
    %62 = arith.addf %61, %60 : vector<2x128xf32>
    %63 = arith.divf %61, %62 : vector<2x128xf32>
    %64 = arith.select %57, %58, %63 : vector<2x128xi1>, vector<2x128xf32>
    %65 = vector.extract_strided_slice %64 {offsets = [0, 0], sizes = [2, 32], strides = [1, 1]} : vector<2x128xf32> to vector<2x32xf32>
    %66 = vector.extract_strided_slice %64 {offsets = [0, 32], sizes = [2, 32], strides = [1, 1]} : vector<2x128xf32> to vector<2x32xf32>
    %67 = vector.extract_strided_slice %64 {offsets = [0, 64], sizes = [2, 32], strides = [1, 1]} : vector<2x128xf32> to vector<2x32xf32>
    %68 = vector.extract_strided_slice %64 {offsets = [0, 96], sizes = [2, 32], strides = [1, 1]} : vector<2x128xf32> to vector<2x32xf32>
    %69 = arith.mulf %66, %4 : vector<2x32xf32>
    %70 = arith.mulf %65, %67 : vector<2x32xf32>
    %71 = arith.addf %69, %70 : vector<2x32xf32>
    %72 = math.tanh %71 : vector<2x32xf32>
    %73 = arith.mulf %68, %72 : vector<2x32xf32>
    %74 = vector.shape_cast %73 : vector<2x32xf32> to vector<2x1x32xf32>
    %75 = vector.broadcast %74 : vector<2x1x32xf32> to vector<2x8x32xf32>
    %76 = arith.mulf %11, %75 : vector<2x8x32xf32>
    %cst_30 = arith.constant dense<0.000000e+00> : vector<2x8xf32>
    %77 = vector.multi_reduction <add>, %76, %cst_30 [2] : vector<2x8x32xf32> to vector<2x8xf32>
    %cst_31 = arith.constant dense<0xFF800000> : vector<2xf32>
    %78 = vector.multi_reduction <maximumf>, %77, %cst_31 [1] : vector<2x8xf32> to vector<2xf32>
    %79 = vector.shape_cast %78 : vector<2xf32> to vector<2x1xf32>
    %80 = vector.broadcast %79 : vector<2x1xf32> to vector<2x8xf32>
    %81 = arith.subf %77, %80 : vector<2x8xf32>
    %82 = math.exp %81 : vector<2x8xf32>
    %cst_32 = arith.constant dense<0.000000e+00> : vector<2xf32>
    %83 = vector.multi_reduction <add>, %82, %cst_32 [1] : vector<2x8xf32> to vector<2xf32>
    %84 = vector.shape_cast %83 : vector<2xf32> to vector<2x1xf32>
    %85 = vector.broadcast %84 : vector<2x1xf32> to vector<2x8xf32>
    %86 = arith.divf %82, %85 : vector<2x8xf32>
    %87 = vector.shape_cast %86 : vector<2x8xf32> to vector<2x8x1xf32>
    %88 = vector.broadcast %87 : vector<2x8x1xf32> to vector<2x8x32xf32>
    %89 = arith.mulf %88, %11 : vector<2x8x32xf32>
    %cst_33 = arith.constant dense<0.000000e+00> : vector<2x32xf32>
    %90 = vector.multi_reduction <add>, %89, %cst_33 [1] : vector<2x8x32xf32> to vector<2x32xf32>
    %91 = tpu.concatenate %90, %73 in 1 : vector<2x32xf32>, vector<2x32xf32> -> vector<2x64xf32>
    %92 = arith.truncf %91 : vector<2x64xf32> to vector<2x64xbf16>
    %cst_34 = arith.constant dense<0.000000e+00> : vector<2x2048xf32>
    %93 = tpu.matmul %92, %12, %cst_34 {dimension_numbers = #tpu.dot_dimension_numbers<[1], [0], [0], [1], [0, 0, 1, 1], [], []>} : vector<2x64xbf16>, vector<64x2048xbf16>, vector<2x2048xf32> -> vector<2x2048xf32>
    %94 = vector.broadcast %13 : vector<1x2048xf32> to vector<2x2048xf32>
    %95 = arith.addf %93, %94 : vector<2x2048xf32>
    %cst_35 = arith.constant 0.000000e+00 : f32
    %96 = vector.broadcast %cst_35 : f32 to vector<2x2048xf32>
    %97 = arith.maximumf %95, %96 : vector<2x2048xf32>
    %98 = arith.truncf %97 : vector<2x2048xf32> to vector<2x2048xbf16>
    %cst_36 = arith.constant dense<0.000000e+00> : vector<2x128xf32>
    %99 = tpu.matmul %98, %14, %cst_36 {dimension_numbers = #tpu.dot_dimension_numbers<[1], [0], [0], [1], [0, 0, 1, 1], [], []>} : vector<2x2048xbf16>, vector<2048x128xbf16>, vector<2x128xf32> -> vector<2x128xf32>
    %100 = vector.broadcast %15 : vector<1x128xf32> to vector<2x128xf32>
    %101 = arith.addf %99, %100 : vector<2x128xf32>
    %c0_37 = arith.constant 0 : index
    %c0_38 = arith.constant 0 : index
    %102 = vector.load %arg12[%c0_37, %c0_38] : memref<2x128xf32, #tpu.memory_space<vmem>>, vector<2x128xf32>
    tpu.vector_store %arg12[%c0_37, %c0_38], %101 {strides = array<i32>} : memref<2x128xf32, #tpu.memory_space<vmem>>, vector<2x128xf32>,
    %103 = tpu.concatenate %47, %73, %45, %71 in 1 : vector<2x32xf32>, vector<2x32xf32>, vector<2x32xf32>, vector<2x32xf32> -> vector<2x128xf32>
    %c0_39 = arith.constant 0 : index
    %c0_40 = arith.constant 0 : index
    %104 = vector.load %arg13[%c0_39, %c0_40] : memref<2x128xf32, #tpu.memory_space<vmem>>, vector<2x128xf32>
    tpu.vector_store %arg13[%c0_39, %c0_40], %103 {strides = array<i32>} : memref<2x128xf32, #tpu.memory_space<vmem>>, vector<2x128xf32>,
    return
  }
}

</mosaic_0001>

<bundles_post_ra>
// kernel: tpu_custom_call.1
= control target key start
LH: loop header
LB: loop body
LE: loop exit
PB: predicated region body
PF: predicated region fallthrough
CT: control target
= control target key end

     0   :  { %19 = vsyncpa [#allocation3], 0  ;;  %s4075_s0 = inlined_call_operand.vmem [shape: s32[2,1], index: 0, kind: input, shape index: {}]   ;;  %s4076_s1 = inlined_call_operand.hbm [shape: f32[2,128], index: 1, kind: input, shape index: {}, may-alias: {1,13}]   ;;  %s4077_s2 = inlined_call_operand.vmem [shape: f32[64,32], index: 2, kind: input, shape index: {}]   ;;  %s4078_s3 = inlined_call_operand.vmem [shape: f32[64,128], index: 3, kind: input, shape index: {}]   ;;  %s4079_s4 = inlined_call_operand.vmem [shape: f32[1,128], index: 4, kind: input, shape index: {}]   ;;  %s4080_s5 = inlined_call_operand.hbm [shape: f32[64,128], index: 5, kind: input, shape index: {}]   ;;  %s4081_s6 = inlined_call_operand.vmem [shape: f32[1,128], index: 6, kind: input, shape index: {}]   ;;  %s4082_s7 = inlined_call_operand.vmem [shape: f32[2,8,32], index: 7, kind: input, shape index: {}]   ;;  %s4083_s8 = inlined_call_operand.hbm [shape: bf16[64,2048], index: 8, kind: input, shape index: {}]   ;;  %s4084_s9 = inlined_call_operand.vmem [shape: f32[1,2048], index: 9, kind: input, shape index: {}]   ;;  %s4085_s10 = inlined_call_operand.hbm [shape: bf16[2048,128], index: 10, kind: input, shape index: {}]   ;;  %s4086_s11 = inlined_call_operand.vmem [shape: f32[1,128], index: 11, kind: input, shape index: {}]   ;;  %s4087_s12 = inlined_call_operand.hbm [shape: f32[2,128], index: 12, kind: output, shape index: {0}]   ;;  %s4088_s13 = inlined_call_operand.hbm [shape: f32[2,128], index: 13, kind: output, shape index: {1}, may-alias: {1,13}]  }
   0x1   :  { %20 = vsyncpa [#allocation6], 0 }
   0x2   :  { %21 = vsyncpa [#allocation9], 0 }
   0x3   :  { %22 = vsyncpa [#allocation4], 0 }
   0x4   :  { %23 = vsyncpa [#allocation12], 0  ;;  %s3635_s25 = smov [#allocation5]   ;;  %s3493_s29 = scalar_lea.hbm %s4080_s5, 1024 }
   0x5   :  { %s47_s26 = sshll.u32 %s3635_s25, 4  ;;  %p3494_p0 = scmp.ne.s32.totalorder %s4080_s5, %s3493_s29  ;;  %s48_s26 = int_to_ptr.vmem [resolvable:$true] %s47_s26 }
   0x6   :  { %p3497_p1 = scmp.lt.u32.totalorder %s3493_s29, %s4080_s5 }
   0x8   :  { %p3499_p2 = pnand %p3497_p1, %p3494_p0 }
   0xa   :  { %3502 = shalt.err (!%p3499_p2)
}
   0xb   :  { %s3503_s17 = scalar_lea.vmem %s48_s26, 1024  ;;  %p3508_p4 = scmp.lt.s32.totalorder %s48_s26, %s48_s26 }
   0xc   :  { %p3504_p3 = scmp.ne.s32.totalorder %s48_s26, %s3503_s17  ;;  %p3509_p5 = scmp.lt.s32.totalorder %s3503_s17, %s3503_s17 }
   0xe   :  { %p3510_p6 = por %p3509_p5, %p3508_p4 }
  0x10   :  { %p3511_p7 = pnand %p3510_p6, %p3504_p3 }
  0x12   :  { %3514 = shalt.err (!%p3511_p7)
}
  0x13   :  { %s3636_s18 = smov 128   ;;  %s3637_s19 = smov 8  }
  0x14   :  { %53 = dma.hbm_to_vmem [thread:$0]  %s4080_s5, 1024, %s48_s26, [#allocation6], %s3636_s18, %s3636_s18, %s3637_s19  }
  0x15   :  { %s3638_s22 = smov [#allocation2]   ;;  %s3639_s24 = smov [#allocation7]  }
  0x16   :  { %s32_s23 = sshll.u32 %s3638_s22, 4  ;;  %s63_s25 = sshll.u32 %s3639_s24, 4  ;;  %s33_s23 = int_to_ptr.vmem [resolvable:$true] %s32_s23  ;;  %s64_s25 = int_to_ptr.vmem [resolvable:$true] %s63_s25 }
  0x17   :  { %s3515_s29 = scalar_lea.hbm %s4076_s1, 32 }
  0x18   :  { %p3516_p8 = scmp.ne.s32.totalorder %s4076_s1, %s3515_s29  ;;  %p3519_p9 = scmp.lt.u32.totalorder %s3515_s29, %s4076_s1 }
  0x1a   :  { %p3521_p10 = pnand %p3519_p9, %p3516_p8 }
  0x1c   :  { %3524 = shalt.err (!%p3521_p10)
}
  0x1d   :  { %s3525_s5 = scalar_lea.vmem %s33_s23, 32  ;;  %p3530_p12 = scmp.lt.s32.totalorder %s33_s23, %s33_s23 }
  0x1e   :  { %p3526_p11 = scmp.ne.s32.totalorder %s33_s23, %s3525_s5  ;;  %p3531_p13 = scmp.lt.s32.totalorder %s3525_s5, %s3525_s5 }
  0x20   :  { %p3532_p0 = por %p3531_p13, %p3530_p12 }
  0x22   :  { %p3533_p1 = pnand %p3532_p0, %p3526_p11 }
  0x24   :  { %3536 = shalt.err (!%p3533_p1)
}
  0x25   :  { %35 = dma.hbm_to_vmem [thread:$0]  %s4076_s1, 32, %s33_s23, [#allocation3]  }
  0x26   :  { %s3537_s20 = scalar_lea.hbm %s4083_s8, 8192 }
  0x27   :  { %p3538_p2 = scmp.ne.s32.totalorder %s4083_s8, %s3537_s20  ;;  %p3541_p3 = scmp.lt.u32.totalorder %s3537_s20, %s4083_s8 }
  0x29   :  { %p3543_p4 = pnand %p3541_p3, %p3538_p2 }
  0x2b   :  { %3546 = shalt.err (!%p3543_p4)
}
  0x2c   :  { %s3547_s28 = scalar_lea.vmem %s64_s25, 8192  ;;  %p3552_p6 = scmp.lt.s32.totalorder %s64_s25, %s64_s25 }
  0x2d   :  { %p3548_p5 = scmp.ne.s32.totalorder %s64_s25, %s3547_s28  ;;  %p3553_p7 = scmp.lt.s32.totalorder %s3547_s28, %s3547_s28 }
  0x2f   :  { %p3554_p8 = por %p3553_p7, %p3552_p6 }
  0x31   :  { %p3555_p9 = pnand %p3554_p8, %p3548_p5 }
  0x33   :  { %3558 = shalt.err (!%p3555_p9)
}
  0x34   :  { %s3640_s1 = smov 1024   ;;  %s3641_s23 = smov 64  }
  0x35   :  { %69 = dma.hbm_to_vmem [thread:$0]  %s4083_s8, 8192, %s64_s25, [#allocation6], %s3640_s1, %s3640_s1, %s3641_s23  }
  0x36   :  { %s3642_s14 = smov [#allocation8]   ;;  %s3559_s26 = scalar_lea.hbm %s4085_s10, 16384 }
  0x37   :  { %s77_s15 = sshll.u32 %s3642_s14, 4  ;;  %p3560_p10 = scmp.ne.s32.totalorder %s4085_s10, %s3559_s26  ;;  %s78_s15 = int_to_ptr.vmem [resolvable:$true] %s77_s15 }
  0x38   :  { %p3563_p11 = scmp.lt.u32.totalorder %s3559_s26, %s4085_s10 }
  0x3a   :  { %p3565_p12 = pnand %p3563_p11, %p3560_p10 }
  0x3c   :  { %3568 = shalt.err (!%p3565_p12)
}
  0x3d   :  { %s3569_s21 = scalar_lea.vmem %s78_s15, 16384  ;;  %p3574_p0 = scmp.lt.s32.totalorder %s78_s15, %s78_s15 }
  0x3e   :  { %p3570_p13 = scmp.ne.s32.totalorder %s78_s15, %s3569_s21  ;;  %p3575_p1 = scmp.lt.s32.totalorder %s3569_s21, %s3569_s21 }
  0x40   :  { %p3576_p2 = por %p3575_p1, %p3574_p0 }
  0x42   :  { %p3577_p3 = pnand %p3576_p2, %p3570_p13 }
  0x44   :  { %3580 = shalt.err (!%p3577_p3)
}
  0x45   :  { %s3643_s8 = smov 4  }
  0x46   :  { %83 = dma.hbm_to_vmem [thread:$0]  %s4085_s10, 16384, %s78_s15, [#allocation9], %s3641_s23, %s3641_s23, %s3643_s8  }
  0x47   :  { %3625 = dma.done.wait [#allocation3], 32  }
  0x48   :  { %3626 = vsyncadd [#allocation3], 4294967264 }
  0x49   :  { %3627 = dma.done.wait [#allocation6], 9216  }
  0x4a   :  { %3628 = vsyncadd [#allocation6], 4294958080 }
  0x4b   :  { %3629 = dma.done.wait [#allocation9], 16384  }
  0x4c   :  { %3630 = vsyncadd [#allocation9], 4294950912  ;;  %v3644_v0 = vmov 0   ;;  %v3645_v1 = vmov 0.0|0.0   ;;  %v100_v2 = vld [vmem:[%s4075_s0] sm:$0x3]  ;;  %v452_v29 = vlaneseq }
  0x4d   :  { %3339 = vset.pattern.permute.xlu0 %v3644_v0  ;;  %3285 = vmatprep.subr.bf16.mxu0 %v3645_v1  ;;  %v101_v3 = vld [vmem:[%s4077_s2] sm:$0xff]  ;;  %v102_v4 = vld [vmem:[%s4077_s2 + $0x8] sm:$0xff]  ;;  %v103_v6 = vld [vmem:[%s4077_s2 + $0x10] sm:$0xff]  ;;  %vm3646_vm0 = vmmov 0   ;;  %v3647_v9 = vmov 0.0   ;;  %s3648_s27 = smov 32  }
  0x4e   :  { %3297 = vmatprep.subr.bf16.mxu1 %v3645_v1  ;;  %3340 = vset.pattern.permute.xlu1 %v3644_v0  ;;  %v3286_v5 = vpack.c.bf16 %v102_v4, %v101_v3  ;;  %v104_v7 = vld [vmem:[%s4077_s2 + $0x18] sm:$0xff]  ;;  %v105_v8 = vld [vmem:[%s4077_s2 + $0x20] sm:$0xff]  ;;  %v110_v13 = vld [vmem:[%s4078_s3 + $0x8] sm:$0xff]  ;;  %v3843_v30 = vand.u32 127, %v452_v29  ;;  %vm460_vm1 = vcmask 523264   ;;  %vm538_vm3 = vcmask 261120  }
  0x4f   :  { %455 = vperm.xlu0 %3339, %v100_v2   ;;  %3244 = vmatprep.mubr.msk.f32.mxu0 %vm3646_vm0, %v3647_v9  ;;  %v3289_v10 = vpack.c.bf16 %v104_v7, %v103_v6  ;;  %v3798_v11 = vld [vmem:[#allocation2] sm:$0x3]  ;;  %v106_v14 = vld [vmem:[%s4077_s2 + $0x28] sm:$0xff]  ;;  %v111_v16 = vld [vmem:[%s4078_s3 + $0x10] sm:$0xff]  ;;  %vm817_vm7 = vcmask 1041409   ;;  %vm820_vm8 = vcmask 58368  }
  0x50   :  { %3263 = vmatprep.mubr.msk.f32.mxu1 %vm3646_vm0, %v3647_v9  ;;  %3287 = vmatpush3.bf16.msra.mxu0 %v3286_v5  ;;  %v109_v12 = vld [vmem:[%s4078_s3] sm:$0xff]  ;;  %v112_v17 = vld [vmem:[%s4078_s3 + $0x18] sm:$0xff]  ;;  %v114_v19 = vld [vmem:[%s4078_s3 + $0x28] sm:$0xff]  ;;  %v3292_v23 = vpack.c.bf16 %v106_v14, %v105_v8  ;;  %vm619_vm4 = vcmp.ge.s32.totalorder %v3843_v30, 64  ;;  %vm620_vm5 = vcmp.lt.s32.totalorder %v3843_v30, 96  ;;  %vm2782_vm9 = vcmask 785408  }
  0x51   :  { %3288 = vmatprep.subr.bf16.mxu0 %v3645_v1  ;;  %v3298_v15 = vpack.c.bf16 %v110_v13, %v109_v12  ;;  %v113_v18 = vld [vmem:[%s4078_s3 + $0x20] sm:$0xff]  ;;  %v107_v20 = vld [vmem:[%s4077_s2 + $0x30] sm:$0xff]  ;;  %v108_v21 = vld [vmem:[%s4077_s2 + $0x38] sm:$0xff]  ;;  %v3301_v22 = vpack.c.bf16 %v112_v17, %v111_v16 }
  0x52   :  { %v115_v24 = vld [vmem:[%s4078_s3 + $0x30] sm:$0xff]  ;;  %v116_v25 = vld [vmem:[%s4078_s3 + $0x38] sm:$0xff]  ;;  %v3304_v26 = vpack.c.bf16 %v114_v19, %v113_v18  ;;  %v3295_v27 = vpack.c.bf16 %v108_v21, %v107_v20  ;;  %v2818_v37 = vld [vmem:[%s4079_s4] ss:$0 sm:$0xff]  ;;  %s3649_s4 = smov 96  }
  0x53   :  { %535 = vrot.lane.b32.xlu0 %v3798_v11, %s3648_s27  ;;  %3299 = vmatpush3.bf16.msra.mxu1 %v3298_v15  ;;  %v3307_v28 = vpack.c.bf16 %v116_v25, %v115_v24  ;;  %vm3856_vm6 = vmand %vm619_vm4, %vm620_vm5  ;;  %v118_v54 = vld [vmem:[#allocation5] sm:$0xff]  ;;  %v119_v55 = vld [vmem:[#allocation5 + $0x8] sm:$0xff]  ;;  %v3650_v25 = vmov 1966171168  }
  0x54   :  { %3290 = vmatpush3.bf16.msra.mxu0 %v3289_v10  ;;  %3300 = vmatprep.subr.bf16.mxu1 %v3645_v1  ;;  %v120_v56 = vld [vmem:[#allocation5 + $0x10] sm:$0xff]  ;;  %v3310_v57 = vpack.c.bf16 %v119_v55, %v118_v54  ;;  %v121_v58 = vld [vmem:[#allocation5 + $0x18] sm:$0xff]  ;;  %v122_v60 = vld [vmem:[#allocation5 + $0x20] sm:$0xff] }
  0x55   :  { %3291 = vmatprep.subr.bf16.mxu0 %v3645_v1  ;;  %v3313_v59 = vpack.c.bf16 %v121_v58, %v120_v56  ;;  %v123_v61 = vld [vmem:[#allocation5 + $0x28] sm:$0xff]  ;;  %v124_v63 = vld [vmem:[#allocation5 + $0x30] sm:$0xff]  ;;  %v125_v2 = vld [vmem:[#allocation5 + $0x38] sm:$0xff] }
  0x56   :  { %v3316_v62 = vpack.c.bf16 %v123_v61, %v122_v60  ;;  %v3319_v4 = vpack.c.bf16 %v125_v2, %v124_v63 }
  0x57   :  { %3302 = vmatpush3.bf16.msra.mxu1 %v3301_v22 }
  0x58   :  { %3293 = vmatpush3.bf16.msra.mxu0 %v3292_v23  ;;  %3303 = vmatprep.subr.bf16.mxu1 %v3645_v1 }
  0x59   :  { %3294 = vmatprep.subr.bf16.mxu0 %v3645_v1 }
  0x5b   :  { %3305 = vmatpush3.bf16.msra.mxu1 %v3304_v26  ;;  %v764_v26 = vunpack.c.l.s4 %v3650_v25  ;;  %v145_v25 = vld [vmem:[#allocation7 + $0x80] sm:$0xff] }
  0x5c   :  { %3296 = vmatpush3.bf16.msra.mxu0 %v3295_v27  ;;  %3306 = vmatprep.subr.bf16.mxu1 %v3645_v1  ;;  %v3894_v27 = vshrl.u32 %v452_v29, 7 }
  0x5d   :  { %3309 = vmatprep.subr.bf16.mxu0 %v3645_v1 }
  0x5e   :  { %v3926_v56 = vsub.s32 1, %v3894_v27 }
  0x5f   :  { %3308 = vmatpush3.bf16.msra.mxu1 %v3307_v28  ;;  %v765_v28 = vunpack.c.0.s8 %v764_v26  ;;  %v153_v26 = vld [vmem:[#allocation7 + $0xc0] sm:$0xff] }
  0xce   :  { %v456_v31 = vpop.permute.xlu0 %455 }
  0xcf   :  { %vm457_vm2 = vcmp.eq.s32.totalorder %v3843_v30, %v456_v31  ;;  %v768_v31 = vsub.s32 %v765_v28, %v3894_v27  ;;  %v146_v28 = vld [vmem:[#allocation7 + $0x88] sm:$0xff] }
  0xd0   :  { %v2816_v32 = vsel %vm457_vm2, 1.0, %v3647_v9 }
  0xd1   :  { %3245 = vmatmul.mubr.msk.f32.vlgmr.msra.gmra.mrb[0].mxu0 %vm460_vm1, %v2816_v32 }
  0xd2   :  { %3282 = vmatprep.mubr.msk.f32.mxu0 %vm3646_vm0, %v3647_v9  ;;  %v536_v33 = vpop.permute.xlu0 %535  ;;  %3311 = vmatpush3.bf16.msra.mxu0 %v3310_v57 }
  0xd3   :  { %3312 = vmatprep.subr.bf16.mxu0 %v3645_v1 }
  0xd6   :  { %3314 = vmatpush3.bf16.msra.mxu0 %v3313_v59 }
  0xd7   :  { %3315 = vmatprep.subr.bf16.mxu0 %v3645_v1 }
  0xda   :  { %3317 = vmatpush3.bf16.msra.mxu0 %v3316_v62 }
  0xdb   :  { %3318 = vmatprep.subr.bf16.mxu0 %v3645_v1  ;;  %v2821_v1 = vld [vmem:[%s4081_s6] ss:$0 sm:$0xff] }
  0xde   :  { %3320 = vmatpush3.bf16.msra.mxu0 %v3319_v4 }
 0x1a4   :  { %v530_v34 = vpop.f32.mrb[0].mxu0 }
 0x1a5   :  { %v539_v35 = vsel %vm538_vm3, %v530_v34, %v536_v33  ;;  %v3246_v36 = vpop.f32.mrb[1].mxu0 }
 0x1a6   :  { %3264 = vmatmul.mubr.msk.f32.vlgmr.msra.gmra.mrb[0].mxu1 %vm460_vm1, %v539_v35  ;;  %v3901_v35 = vsub.s32 0, %v3894_v27 }
 0x1a7   :  { %1349 = vmatprep.mubr.bf16.mxu1 %v3644_v0 }
 0x279   :  { %v615_v38 = vpop.f32.mrb[0].mxu1 }
 0x27a   :  { %v616_v39 = vadd.f32 %v2818_v37, %v615_v38  ;;  %v3265_v40 = vpop.f32.mrb[1].mxu1 }
 0x27b   :  { %v3910_v40 = vld [vmem:[%s4082_s7] sm:$0xff] }
 0x27c   :  { %v2820_v41 = vmul.f32 -1.442695, %v616_v39 }
 0x27e   :  { %3469 = vpow2.f32 %v2820_v41 }
 0x27f   :  { %3471 = vtanh.f32 %v616_v39 }
 0x288   :  { %v3470_v42 = vpop.eup %3469 }
 0x289   :  { %v626_v43 = vadd.f32 1.0, %v3470_v42  ;;  %v3472_v45 = vpop.eup %3471  ;;  %v3915_v42 = vld [vmem:[%s4082_s7 + $0x8] sm:$0xff] }
 0x28b   :  { %3473 = vrcp.f32 %v626_v43 }
 0x295   :  { %v3474_v46 = vpop.eup %3473 }
 0x296   :  { %v629_v47 = vsel %vm3856_vm6, %v3472_v45, %v3474_v46 }
 0x297   :  { %635 = vrot.lane.b32.xlu1 %v629_v47, %s3641_s23 }
 0x29b   :  { %630 = vrot.lane.b32.xlu1 %v3798_v11, %s3649_s4 }
 0x309   :  { %v636_v48 = vpop.permute.xlu1 %635 }
 0x30a   :  { %v638_v49 = vmul.f32 %v636_v48, %v629_v47  ;;  %v811_v48 = vsub.s32 %v3843_v30, %v3894_v27 }
 0x30c   :  { %640 = vrot.lane.b32.xlu0 %v638_v49, %s3648_s27 }
 0x30d   :  { %v631_v50 = vpop.permute.xlu1 %630 }
 0x30e   :  { %v633_v51 = vmul.f32 %v631_v50, %v629_v47 }
 0x37e   :  { %v641_v52 = vpop.permute.xlu0 %640 }
 0x37f   :  { %v3865_v53 = vadd.f32 %v641_v52, %v633_v51 }
 0x381   :  { %3475 = vtanh.f32 %v3865_v53 }
 0x38b   :  { %v3476_v3 = vpop.eup %3475 }
 0x38c   :  { %646 = vrot.lane.b32.xlu1 %v3476_v3, %s3641_s23 }
 0x3fe   :  { %v647_v5 = vpop.permute.xlu1 %646 }
 0x3ff   :  { %v649_v6 = vmul.f32 %v647_v5, %v629_v47 }
 0x401   :  { %651 = vrot.lane.b32.xlu0 %v649_v6, %s3648_s27 }
 0x405   :  { %742 = vrot.lane.b32.xlu0 %v3798_v11, %s3641_s23 }
 0x473   :  { %v3875_v7 = vpop.permute.xlu0 %651 }
 0x474   :  { %v654_v8 = vsel %vm538_vm3, %v3875_v7, %v3798_v11 }
 0x475   :  { %3283 = vmatmul.mubr.msk.f32.vlgmr.msra.gmra.mrb[2].mxu0 %vm460_vm1, %v654_v8 }
 0x476   :  { %1390 = vmatprep.mubr.bf16.mxu0 %v3644_v0 }
 0x477   :  { %v743_v20 = vpop.permute.xlu0 %742 }
 0x548   :  { %v730_v9 = vpop.f32.mrb[2].mxu0 }
 0x549   :  { %v731_v10 = vadd.f32 %v2821_v1, %v730_v9  ;;  %v3284_v12 = vpop.f32.mrb[3].mxu0 }
 0x54b   :  { %v2823_v13 = vmul.f32 -1.442695, %v731_v10 }
 0x54d   :  { %3477 = vpow2.f32 %v2823_v13 }
 0x54e   :  { %3479 = vtanh.f32 %v731_v10 }
 0x557   :  { %v3478_v14 = vpop.eup %3477 }
 0x558   :  { %v738_v15 = vadd.f32 1.0, %v3478_v14  ;;  %v3480_v16 = vpop.eup %3479 }
 0x55a   :  { %3481 = vrcp.f32 %v738_v15 }
 0x564   :  { %v3482_v17 = vpop.eup %3481 }
 0x565   :  { %v741_v11 = vsel %vm3856_vm6, %v3480_v16, %v3482_v17  ;;  %v129_v17 = vld [vmem:[#allocation7] sm:$0xff] }
 0x566   :  { %747 = vrot.lane.b32.xlu1 %v741_v11, %s3641_s23  ;;  %v745_v21 = vmul.f32 %v743_v20, %v741_v11  ;;  %v138_v20 = vld [vmem:[#allocation7 + $0x48] sm:$0xff] }
 0x5d8   :  { %v748_v18 = vpop.permute.xlu1 %747 }
 0x5d9   :  { %v750_v19 = vmul.f32 %v748_v18, %v741_v11  ;;  %v130_v18 = vld [vmem:[#allocation7 + $0x8] sm:$0xff] }
 0x5db   :  { %752 = vrot.lane.b32.xlu1 %v750_v19, %s3648_s27 }
 0x64d   :  { %v753_v22 = vpop.permute.xlu1 %752 }
 0x64e   :  { %v3889_v23 = vadd.f32 %v753_v22, %v745_v21  ;;  %v2826_v22 = vcombine.low %v130_v18, %v138_v20 }
 0x650   :  { %3483 = vtanh.f32 %v3889_v23 }
 0x65a   :  { %v3484_v24 = vpop.eup %3483 }
 0x65b   :  { %758 = vrot.lane.b32.xlu0 %v3484_v24, %s3641_s23  ;;  %v2827_v24 = vcombine.high %v130_v18, %v138_v20 }
 0x65d   :  { %1358 = vmatprep.subr.bf16.mxu0 %v2827_v24  ;;  %v148_v24 = vld [vmem:[#allocation7 + $0x98] sm:$0xff] }
 0x65e   :  { %1359 = vmatpush1.bf16.msra.mxu0 %v2826_v22  ;;  %v155_v22 = vld [vmem:[#allocation7 + $0xd0] sm:$0xff] }
 0x6cd   :  { %v759_v32 = vpop.permute.xlu0 %758 }
 0x6ce   :  { %v3897_v33 = vmul.f32 %v759_v32, %v741_v11  ;;  %v137_v11 = vld [vmem:[#allocation7 + $0x40] sm:$0xff]  ;;  %v154_v32 = vld [vmem:[#allocation7 + $0xc8] sm:$0xff] }
 0x6cf   :  { %v2825_v19 = vcombine.high %v129_v17, %v137_v11  ;;  %v2824_v21 = vcombine.low %v129_v17, %v137_v11 }
 0x6d0   :  { %v769_v34 = vrot.slane %v3897_v33, %v768_v31 }
 0x6d1   :  { %1317 = vmatprep.subr.bf16.mxu1 %v2825_v19 }
 0x6d2   :  { %v770_v36 = vcombine.high %v769_v34, %v769_v34  ;;  %v777_v37 = vrot.slane %v769_v34, %v768_v31  ;;  %1318 = vmatpush1.bf16.msra.mxu1 %v2824_v21  ;;  %v2840_v34 = vcombine.low %v145_v25, %v153_v26  ;;  %v147_v21 = vld [vmem:[#allocation7 + $0x90] sm:$0xff] }
 0x6d4   :  { %v788_v38 = vrot.slane %v777_v37, %v3901_v35  ;;  %v784_v39 = vrot.slane %v770_v36, %v768_v31  ;;  %v2841_v31 = vcombine.high %v145_v25, %v153_v26  ;;  %v2842_v36 = vcombine.low %v146_v28, %v154_v32  ;;  %v156_v25 = vld [vmem:[#allocation7 + $0xd8] sm:$0xff] }
 0x6d5   :  { %v2843_v37 = vcombine.high %v146_v28, %v154_v32  ;;  %v2845_v32 = vcombine.high %v147_v21, %v155_v22 }
 0x6d6   :  { %793 = vrot.lane.b32.xlu1 %v788_v38, %s3648_s27  ;;  %v792_v29 = vrot.slane %v784_v39, %v3901_v35  ;;  %1319 = vmatprep.subr.bf16.mxu1 %v2841_v31  ;;  %v161_v38 = vld [vmem:[#allocation7 + $0x100] sm:$0xff] }
 0x6d7   :  { %1360 = vmatprep.subr.bf16.mxu0 %v2843_v37  ;;  %v169_v39 = vld [vmem:[#allocation7 + $0x140] sm:$0xff]  ;;  %1320 = vmatpush1.bf16.msra.mxu1 %v2840_v34  ;;  %v163_v34 = vld [vmem:[#allocation7 + $0x110] sm:$0xff]  ;;  %v164_v37 = vld [vmem:[#allocation7 + $0x118] sm:$0xff] }
 0x6d8   :  { %795 = vrot.lane.b32.xlu0 %v792_v29, %s3648_s27  ;;  %v162_v29 = vld [vmem:[#allocation7 + $0x108] sm:$0xff]  ;;  %1361 = vmatpush1.bf16.msra.mxu0 %v2842_v36  ;;  %v171_v36 = vld [vmem:[#allocation7 + $0x150] sm:$0xff] }
 0x748   :  { %v794_v41 = vpop.permute.xlu1 %793 }
 0x749   :  { %v799_v43 = vmul.f32 %v794_v41, %v3910_v40  ;;  %v170_v41 = vld [vmem:[#allocation7 + $0x148] sm:$0xff] }
 0x74a   :  { %v796_v44 = vpop.permute.xlu0 %795 }
 0x74b   :  { %v800_v45 = vmul.f32 %v796_v44, %v3915_v42  ;;  %v801_v46 = vsel %vm538_vm3, %v799_v43, 0.0  ;;  %v2856_v43 = vcombine.low %v161_v38, %v169_v39  ;;  %v2858_v44 = vcombine.low %v162_v29, %v170_v41 }
 0x74c   :  { %802 = vadd.xlane.f32.xlu1 %v801_v46  ;;  %v177_v46 = vld [vmem:[#allocation7 + $0x180] sm:$0xff] }
 0x74d   :  { %v804_v47 = vsel %vm538_vm3, %v800_v45, 0.0  ;;  %v2859_v45 = vcombine.high %v162_v29, %v170_v41  ;;  %v2846_v29 = vcombine.low %v148_v24, %v156_v25 }
 0x74e   :  { %805 = vadd.xlane.f32.xlu0 %v804_v47  ;;  %v185_v47 = vld [vmem:[#allocation7 + $0x1c0] sm:$0xff] }
 0x74f   :  { %1362 = vmatprep.subr.bf16.mxu0 %v2859_v45  ;;  %v180_v45 = vld [vmem:[#allocation7 + $0x198] sm:$0xff] }
 0x750   :  { %1363 = vmatpush1.bf16.msra.mxu0 %v2858_v44  ;;  %v187_v44 = vld [vmem:[#allocation7 + $0x1d0] sm:$0xff] }
 0x7d9   :  { %v803_v49 = vpop.xlane.xlu1 %802 }
 0x7da   :  { %v812_v51 = vrot.slane %v803_v49, %v811_v48 }
 0x7db   :  { %v806_v50 = vpop.xlane.xlu0 %805 }
 0x7dc   :  { %v816_v52 = vrot.slane %v806_v50, %v811_v48 }
 0x7de   :  { %v818_v54 = vsel %vm817_vm7, %v816_v52, %v812_v51 }
 0x7df   :  { %v821_v55 = vsel %vm820_vm8, %v818_v54, -inf  ;;  %v131_v54 = vld [vmem:[#allocation7 + $0x10] sm:$0xff] }
 0x7e0   :  { %822 = vmax.xlane.f32.xlu0 %v821_v55  ;;  %v139_v55 = vld [vmem:[#allocation7 + $0x50] sm:$0xff] }
 0x86d   :  { %v823_v57 = vpop.xlane.xlu0 %822 }
 0x86e   :  { %v828_v58 = vrot.slane %v823_v57, %v3901_v35  ;;  %v832_v59 = vrot.slane %v823_v57, %v3926_v56  ;;  %v132_v57 = vld [vmem:[#allocation7 + $0x18] sm:$0xff] }
 0x870   :  { %v835_v30 = vsub.f32 %v803_v49, %v828_v58  ;;  %v836_v60 = vsub.f32 %v806_v50, %v832_v59  ;;  %v186_v49 = vld [vmem:[#allocation7 + $0x1c8] sm:$0xff]  ;;  %v2872_v50 = vcombine.low %v177_v46, %v185_v47  ;;  %v2828_v58 = vcombine.low %v131_v54, %v139_v55  ;;  %v140_v59 = vld [vmem:[#allocation7 + $0x58] sm:$0xff] }
 0x872   :  { %v837_v61 = vmul.f32 1.442695, %v835_v30  ;;  %v839_v62 = vmul.f32 1.442695, %v836_v60  ;;  %v2830_v30 = vcombine.low %v132_v57, %v140_v59  ;;  %v2831_v60 = vcombine.high %v132_v57, %v140_v59  ;;  %v149_v59 = vld [vmem:[#allocation7 + $0xa0] sm:$0xff] }
 0x874   :  { %3485 = vpow2.f32 %v837_v61 }
 0x875   :  { %3487 = vpow2.f32 %v839_v62 }
 0x87e   :  { %v3486_v63 = vpop.eup %3485 }
 0x87f   :  { %v3488_v2 = vpop.eup %3487  ;;  %844 = vperm.xlu1 %3340, %v3486_v63  }
 0x880   :  { %847 = vperm.xlu0 %3339, %v3488_v2  }
 0x8fe   :  { %v845_v3 = vpop.permute.xlu1 %844 }
 0x8ff   :  { %v848_v4 = vpop.permute.xlu0 %847  ;;  %v852_v5 = vrot.slane %v845_v3, %v811_v48 }
 0x900   :  { %v856_v6 = vrot.slane %v848_v4, %v811_v48  ;;  %v178_v48 = vld [vmem:[#allocation7 + $0x188] sm:$0xff] }
 0x901   :  { %v2874_v51 = vcombine.low %v178_v48, %v186_v49  ;;  %v2875_v52 = vcombine.high %v178_v48, %v186_v49 }
 0x902   :  { %v857_v8 = vsel %vm817_vm7, %v856_v6, %v852_v5 }
 0x903   :  { %v859_v1 = vsel %vm820_vm8, %v857_v8, 0.0  ;;  %1364 = vmatprep.subr.bf16.mxu0 %v2875_v52  ;;  %v134_v52 = vld [vmem:[#allocation7 + $0x28] sm:$0xff] }
 0x904   :  { %860 = vadd.xlane.f32.xlu1 %v859_v1  ;;  %1365 = vmatpush1.bf16.msra.mxu0 %v2874_v51  ;;  %v141_v51 = vld [vmem:[#allocation7 + $0x60] sm:$0xff] }
 0x905   :  { %1440 = vmatprep.subr.bf16.mxu0 %v2831_v60  ;;  %v150_v60 = vld [vmem:[#allocation7 + $0xa8] sm:$0xff] }
 0x991   :  { %v861_v9 = vpop.xlane.xlu1 %860 }
 0x992   :  { %v866_v10 = vrot.slane %v861_v9, %v3901_v35  ;;  %v870_v12 = vrot.slane %v861_v9, %v3926_v56 }
 0x994   :  { %3489 = vrcp.f32 %v866_v10 }
 0x995   :  { %3491 = vrcp.f32 %v870_v12 }
 0x99e   :  { %v3490_v13 = vpop.eup %3489 }
 0x99f   :  { %v874_v14 = vmul.f32 %v3490_v13, %v3486_v63  ;;  %v3492_v15 = vpop.eup %3491 }
 0x9a0   :  { %v876_v16 = vmul.f32 %v3492_v15, %v3488_v2 }
 0x9a1   :  { %879 = vperm.xlu0 %3339, %v874_v14  }
 0x9a5   :  { %884 = vperm.xlu0 %3339, %v876_v16  }
 0x9a9   :  { %907 = vrot.lane.b32.xlu0 %v3897_v33, %s3641_s23  ;;  %v2857_v33 = vcombine.high %v161_v38, %v169_v39  ;;  %v172_v38 = vld [vmem:[#allocation7 + $0x158] sm:$0xff]  ;;  %v2844_v39 = vcombine.low %v147_v21, %v155_v22 }
 0x9aa   :  { %v2863_v41 = vcombine.high %v164_v37, %v172_v38  ;;  %v2862_v48 = vcombine.low %v164_v37, %v172_v38  ;;  %v144_v21 = vld [vmem:[#allocation7 + $0x78] sm:$0xff] }
 0x9ab   :  { %1321 = vmatprep.subr.bf16.mxu1 %v2857_v33  ;;  %v2861_v33 = vcombine.high %v163_v34, %v171_v36 }
 0x9ac   :  { %1322 = vmatpush1.bf16.msra.mxu1 %v2856_v43  ;;  %v179_v43 = vld [vmem:[#allocation7 + $0x190] sm:$0xff] }
 0x9ad   :  { %2773 = vrot.lane.b32.xlu0 %v3865_v53, %s3648_s27  ;;  %v2873_v53 = vcombine.high %v177_v46, %v185_v47  ;;  %v188_v46 = vld [vmem:[#allocation7 + $0x1d8] sm:$0xff]  ;;  %v2860_v47 = vcombine.low %v163_v34, %v171_v36 }
 0x9ae   :  { %v2879_v49 = vcombine.high %v180_v45, %v188_v46  ;;  %v2878_v57 = vcombine.low %v180_v45, %v188_v46  ;;  %v160_v34 = vld [vmem:[#allocation7 + $0xf8] sm:$0xff] }
 0x9af   :  { %1323 = vmatprep.subr.bf16.mxu1 %v2873_v53  ;;  %v2877_v53 = vcombine.high %v179_v43, %v187_v44 }
 0x9b0   :  { %1324 = vmatpush1.bf16.msra.mxu1 %v2872_v50  ;;  %v133_v50 = vld [vmem:[#allocation7 + $0x20] sm:$0xff] }
 0x9b1   :  { %2777 = vrot.lane.b32.xlu0 %v3889_v23, %s3641_s23  ;;  %v2829_v23 = vcombine.high %v131_v54, %v139_v55  ;;  %v142_v54 = vld [vmem:[#allocation7 + $0x68] sm:$0xff]  ;;  %v2876_v55 = vcombine.low %v179_v43, %v187_v44  ;;  %v176_v43 = vld [vmem:[#allocation7 + $0x178] sm:$0xff] }
 0x9b3   :  { %1399 = vmatprep.subr.bf16.mxu1 %v2829_v23  ;;  %v2835_v23 = vcombine.high %v134_v52, %v142_v54 }
 0xa20   :  { %v880_v61 = vpop.permute.xlu0 %879 }
 0xa21   :  { %v887_v62 = vmul.f32 %v880_v61, %v3910_v40  ;;  %v158_v61 = vld [vmem:[#allocation7 + $0xe8] sm:$0xff] }
 0xa23   :  { %v889_v63 = vsel %vm538_vm3, %v887_v62, 0.0  ;;  %v2832_v62 = vcombine.low %v133_v50, %v141_v51 }
 0xa24   :  { %v890_v2 = vrot.slane %v889_v63, 4  ;;  %v885_v3 = vpop.permute.xlu0 %884 }
 0xa25   :  { %v888_v4 = vmul.f32 %v885_v3, %v3915_v42  ;;  %v2851_v3 = vcombine.high %v150_v60, %v158_v61 }
 0xa26   :  { %v891_v5 = vadd.f32 %v890_v2, %v889_v63  ;;  %v2834_v63 = vcombine.low %v134_v52, %v142_v54 }
 0xa27   :  { %v896_v6 = vsel %vm538_vm3, %v888_v4, 0.0  ;;  %v165_v4 = vld [vmem:[#allocation7 + $0x120] sm:$0xff] }
 0xa28   :  { %v892_v8 = vrot.slane %v891_v5, 2  ;;  %v897_v1 = vrot.slane %v896_v6, 4  ;;  %v908_v9 = vpop.permute.xlu0 %907 }
 0xa29   :  { %v2780_v40 = vsel %vm538_vm3, %v3875_v7, %v908_v9  ;;  %v2847_v7 = vcombine.high %v148_v24, %v156_v25 }
 0xa2a   :  { %v893_v10 = vadd.f32 %v892_v8, %v891_v5  ;;  %v898_v12 = vadd.f32 %v897_v1, %v896_v6  ;;  %v173_v5 = vld [vmem:[#allocation7 + $0x160] sm:$0xff]  ;;  %v166_v6 = vld [vmem:[#allocation7 + $0x128] sm:$0xff] }
 0xa2b   :  { %v174_v8 = vld [vmem:[#allocation7 + $0x168] sm:$0xff] }
 0xa2c   :  { %v899_v13 = vrot.slane %v898_v12, 2  ;;  %v2774_v14 = vpop.permute.xlu0 %2773  ;;  %v894_v15 = vrot.slane %v893_v10, 1 }
 0xa2d   :  { %v2781_v11 = vsel %vm460_vm1, %v2780_v40, %v2774_v14  ;;  %v189_v14 = vld [vmem:[#allocation7 + $0x1e0] sm:$0xff]  ;;  %v2864_v40 = vcombine.low %v165_v4, %v173_v5 }
 0xa2e   :  { %v900_v16 = vadd.f32 %v899_v13, %v898_v12  ;;  %v895_v19 = vadd.f32 %v894_v15, %v893_v10  ;;  %v2865_v10 = vcombine.high %v165_v4, %v173_v5  ;;  %v2867_v12 = vcombine.high %v166_v6, %v174_v8  ;;  %v181_v13 = vld [vmem:[#allocation7 + $0x1a0] sm:$0xff]  ;;  %v182_v15 = vld [vmem:[#allocation7 + $0x1a8] sm:$0xff]  ;;  %v3351_v4 = vld [vmem:[#allocation8 + $0x10] sm:$0xff]  }
 0xa2f   :  { %v2880_v22 = vcombine.low %v181_v13, %v189_v14  ;;  %v3352_v5 = vld [vmem:[#allocation8 + $0x90] sm:$0xff]  }
 0xa30   :  { %v901_v17 = vrot.slane %v900_v16, 1  ;;  %v2778_v42 = vpop.permute.xlu0 %2777 }
 0xa31   :  { %v2783_v18 = vsel %vm2782_vm9, %v2781_v11, %v2778_v42  ;;  %v2881_v11 = vcombine.high %v181_v13, %v189_v14  ;;  %v3360_v13 = vld [vmem:[#allocation8 + $0xa0] sm:$0xff]   ;;  %v3361_v14 = vld [vmem:[#allocation8 + $0x68] sm:$0xff]  }
 0xa32   :  { %v902_v20 = vadd.f32 %v901_v17, %v900_v16  ;;  %2784 = vst [vmem:[#allocation11] sm:$0x3] %v2783_v18  ;;  %v190_v16 = vld [vmem:[#allocation7 + $0x1e8] sm:$0xff]  ;;  %v2866_v17 = vcombine.low %v166_v6, %v174_v8  ;;  %v135_v18 = vld [vmem:[#allocation7 + $0x30] sm:$0xff]  ;;  %v3353_v6 = vld [vmem:[#allocation8 + $0x58] sm:$0xff]  }
 0xa33   :  { %v2883_v42 = vcombine.high %v182_v15, %v190_v16  ;;  %v2882_v24 = vcombine.low %v182_v15, %v190_v16  ;;  %v3354_v8 = vld [vmem:[#allocation8 + $0xd8] sm:$0xff]   ;;  %v3362_v15 = vld [vmem:[#allocation8 + $0xe8] sm:$0xff]  }
 0xa34   :  { %v905_v26 = vsel %vm817_vm7, %v902_v20, %v895_v19  ;;  %v143_v19 = vld [vmem:[#allocation7 + $0x70] sm:$0xff]  ;;  %v136_v20 = vld [vmem:[#allocation7 + $0x38] sm:$0xff]  ;;  %v3363_v16 = vld [vmem:[#allocation8 + $0x28] sm:$0xff]  }
 0xa35   :  { %v910_v28 = vsel %vm538_vm3, %v905_v26, %v908_v9  ;;  %v2850_v9 = vcombine.low %v150_v60, %v158_v61  ;;  %v2837_v25 = vcombine.high %v135_v18, %v143_v19  ;;  %v2839_v26 = vcombine.high %v136_v20, %v144_v21  ;;  %v3345_v60 = vld [vmem:[#allocation8 + $0x48] sm:$0xff]  }
 0xa36   :  { %v3949_v31 = vpack.c.bf16 %v910_v28, %v910_v28  ;;  %v151_v28 = vld [vmem:[#allocation7 + $0xb0] sm:$0xff]  ;;  %v2836_v36 = vcombine.low %v135_v18, %v143_v19  ;;  %v2838_v37 = vcombine.low %v136_v20, %v144_v21  ;;  %v3346_v61 = vld [vmem:[#allocation8 + $0xc8] sm:$0xff]   ;;  %v3369_v19 = vld [vmem:[#allocation8 + $0x78] sm:$0xff]  }
 0xa37   :  { %v3368_v18 = vld [vmem:[#allocation8 + $0xb0] sm:$0xff]   ;;  %v3370_v20 = vld [vmem:[#allocation8 + $0xf8] sm:$0xff]  }
 0xa38   :  { %2888 = vmatmul.mubr.msk.bf16.vlgmr.msra.gmra.mrb[4].mxu1 %vm460_vm1, %v3949_v31  ;;  %2889 = vmatmul.mubr.msk.bf16.vlgmr.msra.gmra.mrb[4].mxu0 %vm460_vm1, %v3949_v31  ;;  %v3371_v21 = vld [vmem:[#allocation8 + $0x38] sm:$0xff]  }
 0xa39   :  { %1400 = vmatpush1.bf16.msra.mxu1 %v2828_v58  ;;  %1441 = vmatpush1.bf16.msra.mxu0 %v2830_v30  ;;  %v2833_v58 = vcombine.high %v133_v50, %v141_v51  ;;  %v157_v30 = vld [vmem:[#allocation7 + $0xe0] sm:$0xff]  ;;  %v192_v50 = vld [vmem:[#allocation7 + $0x1f8] sm:$0xff] }
 0xa3a   :  { %1401 = vmatprep.subr.bf16.mxu1 %v2845_v32  ;;  %1442 = vmatprep.subr.bf16.mxu0 %v2847_v7  ;;  %v2849_v2 = vcombine.high %v149_v59, %v157_v30  ;;  %v2848_v1 = vcombine.low %v149_v59, %v157_v30  ;;  %v159_v32 = vld [vmem:[#allocation7 + $0xf0] sm:$0xff]  ;;  %v152_v7 = vld [vmem:[#allocation7 + $0xb8] sm:$0xff]  ;;  %v3342_v59 = vld [vmem:[#allocation8 + $0xc0] sm:$0xff]  }
 0xa3b   :  { %1431 = vmatprep.mubr.bf16.mxu1 %v3644_v0  ;;  %1472 = vmatprep.mubr.bf16.mxu0 %v3644_v0  ;;  %v2853_v38 = vcombine.high %v151_v28, %v159_v32  ;;  %v2852_v44 = vcombine.low %v151_v28, %v159_v32  ;;  %v2854_v45 = vcombine.low %v152_v7, %v160_v34  ;;  %v3343_v30 = vld [vmem:[#allocation8] sm:$0xff]  }
 0xa3c   :  { %v3977_v28 = vld [vmem:[%s4084_s9 + $0x8] sm:$0xff] }
 0xa3d   :  { %1402 = vmatpush1.bf16.msra.mxu1 %v2844_v39  ;;  %1443 = vmatpush1.bf16.msra.mxu0 %v2846_v29  ;;  %v2855_v39 = vcombine.high %v152_v7, %v160_v34  ;;  %v167_v29 = vld [vmem:[#allocation7 + $0x130] sm:$0xff]  ;;  %v924_v7 = vsub.s32 2, %v3894_v27  ;;  %v3988_v34 = vld [vmem:[%s4084_s9] sm:$0xff]  ;;  %s3651_s9 = smov [#allocation11]  }
 0xa3e   :  { %1403 = vmatprep.subr.bf16.mxu1 %v2861_v33  ;;  %1444 = vmatprep.subr.bf16.mxu0 %v2863_v41  ;;  %v175_v33 = vld [vmem:[#allocation7 + $0x170] sm:$0xff]  ;;  %v168_v41 = vld [vmem:[#allocation7 + $0x138] sm:$0xff]  ;;  %s2801_s24 = sshll.u32 %s3651_s9, 4  ;;  %s2802_s24 = int_to_ptr.vmem [resolvable:$true] %s2801_s24 }
 0xa3f   :  { %v2869_v46 = vcombine.high %v167_v29, %v175_v33  ;;  %v2868_v51 = vcombine.low %v167_v29, %v175_v33  ;;  %v2870_v52 = vcombine.low %v168_v41, %v176_v43  ;;  %s3581_s27 = scalar_lea.vmem %s2802_s24, 32  ;;  %p3586_p5 = scmp.lt.s32.totalorder %s2802_s24, %s2802_s24 }
 0xa40   :  { %p3582_p4 = scmp.ne.s32.totalorder %s2802_s24, %s3581_s27  ;;  %p3587_p6 = scmp.lt.s32.totalorder %s3581_s27, %s3581_s27 }
 0xa41   :  { %1404 = vmatpush1.bf16.msra.mxu1 %v2860_v47  ;;  %1445 = vmatpush1.bf16.msra.mxu0 %v2862_v48  ;;  %v2871_v47 = vcombine.high %v168_v41, %v176_v43  ;;  %v183_v48 = vld [vmem:[#allocation7 + $0x1b0] sm:$0xff] }
 0xa42   :  { %1405 = vmatprep.subr.bf16.mxu1 %v2877_v53  ;;  %1446 = vmatprep.subr.bf16.mxu0 %v2879_v49  ;;  %v191_v53 = vld [vmem:[#allocation7 + $0x1f0] sm:$0xff]  ;;  %v184_v49 = vld [vmem:[#allocation7 + $0x1b8] sm:$0xff]  ;;  %p3588_p7 = por %p3587_p6, %p3586_p5 }
 0xa43   :  { %v2885_v54 = vcombine.high %v183_v48, %v191_v53 }
 0xa44   :  { %p3589_p8 = pnand %p3588_p7, %p3582_p4 }
 0xa45   :  { %1406 = vmatpush1.bf16.msra.mxu1 %v2876_v55  ;;  %1447 = vmatpush1.bf16.msra.mxu0 %v2878_v57  ;;  %v2887_v55 = vcombine.high %v184_v49, %v192_v50  ;;  %v2884_v57 = vcombine.low %v183_v48, %v191_v53 }
 0xa46   :  { %1481 = vmatprep.subr.bf16.mxu1 %v2833_v58  ;;  %1522 = vmatprep.subr.bf16.mxu0 %v2835_v23  ;;  %v2886_v58 = vcombine.low %v184_v49, %v192_v50  ;;  %v3341_v23 = vld [vmem:[#allocation8 + $0x40] sm:$0xff]  }
 0xa48   :  { %2890 = vmatmul.mubr.msk.bf16.vlgmr.msra.gmra.mrb[8].mxu1 %vm460_vm1, %v3949_v31  ;;  %2891 = vmatmul.mubr.msk.bf16.vlgmr.msra.gmra.mrb[8].mxu0 %vm460_vm1, %v3949_v31 }
 0xa49   :  { %1482 = vmatpush1.bf16.msra.mxu1 %v2832_v62  ;;  %1523 = vmatpush1.bf16.msra.mxu0 %v2834_v63  ;;  %v3347_v62 = vld [vmem:[#allocation8 + $0x8] sm:$0xff]  }
 0xa4a   :  { %1483 = vmatprep.subr.bf16.mxu1 %v2849_v2  ;;  %1524 = vmatprep.subr.bf16.mxu0 %v2851_v3  ;;  %v3348_v63 = vld [vmem:[#allocation8 + $0x88] sm:$0xff]   ;;  %v3349_v2 = vld [vmem:[#allocation8 + $0x50] sm:$0xff]  }
 0xa4b   :  { %1513 = vmatprep.mubr.bf16.mxu1 %v3644_v0  ;;  %1554 = vmatprep.mubr.bf16.mxu0 %v3644_v0  ;;  %v3350_v3 = vld [vmem:[#allocation8 + $0xd0] sm:$0xff]  }
 0xa4d   :  { %1484 = vmatpush1.bf16.msra.mxu1 %v2848_v1  ;;  %1525 = vmatpush1.bf16.msra.mxu0 %v2850_v9  ;;  %v3355_v1 = vld [vmem:[#allocation8 + $0x18] sm:$0xff]   ;;  %v3357_v9 = vld [vmem:[#allocation8 + $0x60] sm:$0xff]  }
 0xa4e   :  { %1485 = vmatprep.subr.bf16.mxu1 %v2865_v10  ;;  %1526 = vmatprep.subr.bf16.mxu0 %v2867_v12  ;;  %v3358_v10 = vld [vmem:[#allocation8 + $0xe0] sm:$0xff]  }
 0xa4f   :  { %v3359_v12 = vld [vmem:[#allocation8 + $0x20] sm:$0xff]  }
 0xa51   :  { %1486 = vmatpush1.bf16.msra.mxu1 %v2864_v40  ;;  %1527 = vmatpush1.bf16.msra.mxu0 %v2866_v17  ;;  %v3364_v40 = vld [vmem:[#allocation8 + $0xa8] sm:$0xff]   ;;  %v3365_v17 = vld [vmem:[#allocation8 + $0x70] sm:$0xff]  }
 0xa52   :  { %1487 = vmatprep.subr.bf16.mxu1 %v2881_v11  ;;  %1528 = vmatprep.subr.bf16.mxu0 %v2883_v42  ;;  %v3366_v11 = vld [vmem:[#allocation8 + $0xf0] sm:$0xff]  }
 0xa53   :  { %v3367_v42 = vld [vmem:[#allocation8 + $0x30] sm:$0xff]  }
 0xa55   :  { %1488 = vmatpush1.bf16.msra.mxu1 %v2880_v22  ;;  %1529 = vmatpush1.bf16.msra.mxu0 %v2882_v24  ;;  %v3372_v22 = vld [vmem:[#allocation8 + $0xb8] sm:$0xff]   ;;  %v3373_v24 = vld [vmem:[#allocation8 + $0x140] sm:$0xff]  }
 0xa56   :  { %1563 = vmatprep.subr.bf16.mxu1 %v2837_v25  ;;  %1604 = vmatprep.subr.bf16.mxu0 %v2839_v26  ;;  %v3374_v25 = vld [vmem:[#allocation8 + $0x1c0] sm:$0xff]   ;;  %v940_v26 = vsub.s32 6, %v3894_v27 }
 0xa58   :  { %2892 = vmatmul.mubr.msk.bf16.vlgmr.msra.gmra.mrb[12].mxu1 %vm460_vm1, %v3949_v31  ;;  %2893 = vmatmul.mubr.msk.bf16.vlgmr.msra.gmra.mrb[12].mxu0 %vm460_vm1, %v3949_v31  ;;  %v3982_v32 = vrot.slane %v3977_v28, %v940_v26 }
 0xa59   :  { %1564 = vmatpush1.bf16.msra.mxu1 %v2836_v36  ;;  %1605 = vmatpush1.bf16.msra.mxu0 %v2838_v37  ;;  %v928_v36 = vsub.s32 3, %v3894_v27  ;;  %v917_v37 = vrot.slane %v3988_v34, %v3901_v35 }
 0xa5a   :  { %1565 = vmatprep.subr.bf16.mxu1 %v2853_v38  ;;  %1606 = vmatprep.subr.bf16.mxu0 %v2855_v39  ;;  %v925_v38 = vrot.slane %v3988_v34, %v924_v7  ;;  %v921_v39 = vrot.slane %v3988_v34, %v3926_v56 }
 0xa5b   :  { %1595 = vmatprep.mubr.bf16.mxu1 %v3644_v0  ;;  %1636 = vmatprep.mubr.bf16.mxu0 %v3644_v0  ;;  %v3344_v0 = vld [vmem:[#allocation8 + $0x80] sm:$0xff]   ;;  %v929_v29 = vrot.slane %v3988_v34, %v928_v36 }
 0xa5d   :  { %1566 = vmatpush1.bf16.msra.mxu1 %v2852_v44  ;;  %1607 = vmatpush1.bf16.msra.mxu0 %v2854_v45 }
 0xa5e   :  { %1567 = vmatprep.subr.bf16.mxu1 %v2869_v46  ;;  %1608 = vmatprep.subr.bf16.mxu0 %v2871_v47 }
 0xa61   :  { %1568 = vmatpush1.bf16.msra.mxu1 %v2868_v51  ;;  %1609 = vmatpush1.bf16.msra.mxu0 %v2870_v52 }
 0xa62   :  { %1569 = vmatprep.subr.bf16.mxu1 %v2885_v54  ;;  %1610 = vmatprep.subr.bf16.mxu0 %v2887_v55 }
 0xa65   :  { %1570 = vmatpush1.bf16.msra.mxu1 %v2884_v57  ;;  %1611 = vmatpush1.bf16.msra.mxu0 %v2886_v58 }
 0xa66   :  { %3052 = vmatprep.subr.bf16.mxu1 %v3341_v23  ;;  %3074 = vmatprep.subr.bf16.mxu0 %v3342_v59  ;;  %v3375_v59 = vld [vmem:[#allocation8 + $0x100] sm:$0xff]  }
 0xa68   :  { %2894 = vmatmul.mubr.msk.bf16.vlgmr.msra.gmra.mrb[16].mxu1 %vm460_vm1, %v3949_v31  ;;  %2895 = vmatmul.mubr.msk.bf16.vlgmr.msra.gmra.mrb[16].mxu0 %vm460_vm1, %v3949_v31  ;;  %v3356_v31 = vld [vmem:[#allocation8 + $0x98] sm:$0xff]  }
 0xa69   :  { %3053 = vmatpush3.bf16.msra.mxu1 %v3343_v30  ;;  %3075 = vmatpush3.bf16.msra.mxu0 %v3344_v0  ;;  %v3376_v30 = vld [vmem:[#allocation8 + $0x180] sm:$0xff]  }
 0xa6a   :  { %3054 = vmatprep.subr.bf16.mxu1 %v3345_v60  ;;  %3076 = vmatprep.subr.bf16.mxu0 %v3346_v61  ;;  %v3377_v61 = vld [vmem:[#allocation8 + $0x148] sm:$0xff]  }
 0xa6d   :  { %3055 = vmatpush3.bf16.msra.mxu1 %v3347_v62  ;;  %3077 = vmatpush3.bf16.msra.mxu0 %v3348_v63  ;;  %v3378_v62 = vld [vmem:[#allocation8 + $0x1c8] sm:$0xff]  }
 0xa6e   :  { %3056 = vmatprep.subr.bf16.mxu1 %v3349_v2  ;;  %3078 = vmatprep.subr.bf16.mxu0 %v3350_v3  ;;  %v3379_v63 = vld [vmem:[#allocation8 + $0x108] sm:$0xff]   ;;  %v936_v3 = vsub.s32 5, %v3894_v27 }
 0xa6f   :  { %v3380_v2 = vld [vmem:[#allocation8 + $0x188] sm:$0xff]  }
 0xa71   :  { %3057 = vmatpush3.bf16.msra.mxu1 %v3351_v4  ;;  %3079 = vmatpush3.bf16.msra.mxu0 %v3352_v5  ;;  %v944_v4 = vsub.s32 7, %v3894_v27  ;;  %v3381_v5 = vld [vmem:[#allocation8 + $0x150] sm:$0xff]  }
 0xa72   :  { %3058 = vmatprep.subr.bf16.mxu1 %v3353_v6  ;;  %3080 = vmatprep.subr.bf16.mxu0 %v3354_v8  ;;  %v3382_v6 = vld [vmem:[#allocation8 + $0x1d0] sm:$0xff]   ;;  %v937_v8 = vrot.slane %v3988_v34, %v936_v3 }
 0xa75   :  { %3059 = vmatpush3.bf16.msra.mxu1 %v3355_v1  ;;  %3081 = vmatpush3.bf16.msra.mxu0 %v3356_v31  ;;  %v945_v1 = vrot.slane %v3988_v34, %v944_v4  ;;  %v3383_v31 = vld [vmem:[#allocation8 + $0x110] sm:$0xff]  }
 0xa76   :  { %3060 = vmatprep.subr.bf16.mxu1 %v3357_v9  ;;  %3082 = vmatprep.subr.bf16.mxu0 %v3358_v10  ;;  %v3384_v9 = vld [vmem:[#allocation8 + $0x190] sm:$0xff]   ;;  %v3385_v10 = vld [vmem:[#allocation8 + $0x158] sm:$0xff]  }
 0xa79   :  { %3061 = vmatpush3.bf16.msra.mxu1 %v3359_v12  ;;  %3083 = vmatpush3.bf16.msra.mxu0 %v3360_v13  ;;  %v3386_v12 = vld [vmem:[#allocation8 + $0x1d8] sm:$0xff]  }
 0xa7a   :  { %3062 = vmatprep.subr.bf16.mxu1 %v3361_v14  ;;  %3084 = vmatprep.subr.bf16.mxu0 %v3362_v15 }
 0xa7d   :  { %3063 = vmatpush3.bf16.msra.mxu1 %v3363_v16  ;;  %3085 = vmatpush3.bf16.msra.mxu0 %v3364_v40 }
 0xa7e   :  { %3064 = vmatprep.subr.bf16.mxu1 %v3365_v17  ;;  %3086 = vmatprep.subr.bf16.mxu0 %v3366_v11 }
 0xa81   :  { %3065 = vmatpush3.bf16.msra.mxu1 %v3367_v42  ;;  %3087 = vmatpush3.bf16.msra.mxu0 %v3368_v18  ;;  %v3387_v18 = vld [vmem:[#allocation8 + $0x118] sm:$0xff]  }
 0xa82   :  { %3066 = vmatprep.subr.bf16.mxu1 %v3369_v19  ;;  %3088 = vmatprep.subr.bf16.mxu0 %v3370_v20  ;;  %v3388_v19 = vld [vmem:[#allocation8 + $0x198] sm:$0xff]  }
 0xa85   :  { %3067 = vmatpush3.bf16.msra.mxu1 %v3371_v21  ;;  %3089 = vmatpush3.bf16.msra.mxu0 %v3372_v22  ;;  %v3389_v22 = vld [vmem:[#allocation8 + $0x160] sm:$0xff]  }
 0xa86   :  { %3096 = vmatprep.subr.bf16.mxu1 %v3373_v24  ;;  %3118 = vmatprep.subr.bf16.mxu0 %v3374_v25  ;;  %v3390_v24 = vld [vmem:[#allocation8 + $0x1e0] sm:$0xff]  }
 0xb0b   :  { %v1351_v33 = vpop.f32.mrb[4].mxu1  ;;  %v1392_v41 = vpop.f32.mrb[4].mxu0 }
 0xb0c   :  { %v1352_v43 = vadd.f32 %v1351_v33, %v917_v37  ;;  %v1393_v44 = vadd.f32 %v1392_v41, %v925_v38  ;;  %v1353_v45 = vpop.f32.mrb[5].mxu1  ;;  %v1394_v46 = vpop.f32.mrb[5].mxu0  ;;  %v3392_v33 = vld [vmem:[#allocation8 + $0x1a0] sm:$0xff]   ;;  %v932_v41 = vsub.s32 4, %v3894_v27  ;;  %v3436_v27 = vld [vmem:[#allocation8 + $0x2b8] sm:$0xff]  }
 0xb0d   :  { %v1354_v47 = vadd.f32 %v1353_v45, %v921_v39  ;;  %v1395_v48 = vadd.f32 %v1394_v46, %v929_v29  ;;  %v1355_v53 = vpop.f32.mrb[6].mxu1  ;;  %v1396_v49 = vpop.f32.mrb[6].mxu0  ;;  %v3391_v29 = vld [vmem:[#allocation8 + $0x120] sm:$0xff]   ;;  %v3395_v45 = vld [vmem:[#allocation8 + $0x128] sm:$0xff]  }
 0xb0e   :  { %v1645_v50 = vmax.f32 %v1352_v43, 0.0  ;;  %v1647_v51 = vmax.f32 %v1393_v44, 0.0  ;;  %v1356_v52 = vpop.f32.mrb[7].mxu1  ;;  %v1397_v54 = vpop.f32.mrb[7].mxu0  ;;  %v3393_v43 = vld [vmem:[#allocation8 + $0x168] sm:$0xff]   ;;  %v3397_v53 = vld [vmem:[#allocation8 + $0x170] sm:$0xff]  }
 0xb0f   :  { %v1646_v55 = vmax.f32 %v1354_v47, 0.0  ;;  %v1648_v57 = vmax.f32 %v1395_v48, 0.0  ;;  %v3394_v44 = vld [vmem:[#allocation8 + $0x1e8] sm:$0xff]   ;;  %v933_v47 = vrot.slane %v3988_v34, %v932_v41  ;;  %v941_v48 = vrot.slane %v3988_v34, %v940_v26  ;;  %v3398_v49 = vld [vmem:[#allocation8 + $0x1f0] sm:$0xff]  }
 0xb10   :  { %v1661_v0 = vpack.c.bf16 %v1645_v50, %v1645_v50  ;;  %v1663_v60 = vpack.c.bf16 %v1647_v51, %v1647_v51  ;;  %v3396_v46 = vld [vmem:[#allocation8 + $0x1a8] sm:$0xff]   ;;  %v957_v50 = vrot.slane %v3977_v28, %v924_v7  ;;  %v953_v51 = vrot.slane %v3977_v28, %v3926_v56  ;;  %v3399_v54 = vld [vmem:[#allocation8 + $0x130] sm:$0xff]  }
 0xb11   :  { %v1662_v58 = vpack.c.bf16 %v1646_v55, %v1646_v55  ;;  %v1664_v23 = vpack.c.bf16 %v1648_v57, %v1648_v57  ;;  %v961_v52 = vrot.slane %v3977_v28, %v928_v36  ;;  %v3400_v55 = vld [vmem:[#allocation8 + $0x1b0] sm:$0xff]   ;;  %v3401_v57 = vld [vmem:[#allocation8 + $0x178] sm:$0xff]  }
 0xb12   :  { %v3403_v36 = vld [vmem:[#allocation8 + $0x138] sm:$0xff]  }
 0xb13   :  { %2483 = vmatprep.mubr.bf16.mxu1 %v1662_v58  ;;  %2523 = vmatprep.mubr.bf16.mxu0 %v1664_v23  ;;  %v3402_v58 = vld [vmem:[#allocation8 + $0x1f8] sm:$0xff]  }
 0xb14   :  { %2484 = vmatmul.mubr.bf16.vlgmr.msra.gmra.mrb[20].mxu1 %v1661_v0  ;;  %2524 = vmatmul.mubr.bf16.vlgmr.msra.gmra.mrb[20].mxu0 %v1663_v60 }
 0xb15   :  { %3097 = vmatpush3.bf16.msra.mxu1 %v3375_v59  ;;  %3119 = vmatpush3.bf16.msra.mxu0 %v3376_v30 }
 0xb16   :  { %3098 = vmatprep.subr.bf16.mxu1 %v3377_v61  ;;  %3120 = vmatprep.subr.bf16.mxu0 %v3378_v62 }
 0xb19   :  { %3099 = vmatpush3.bf16.msra.mxu1 %v3379_v63  ;;  %3121 = vmatpush3.bf16.msra.mxu0 %v3380_v2  ;;  %v3404_v63 = vld [vmem:[#allocation8 + $0x1b8] sm:$0xff]  }
 0xb1a   :  { %3100 = vmatprep.subr.bf16.mxu1 %v3381_v5  ;;  %3122 = vmatprep.subr.bf16.mxu0 %v3382_v6 }
 0xb1b   :  { %v1433_v13 = vpop.f32.mrb[8].mxu1  ;;  %v1474_v14 = vpop.f32.mrb[8].mxu0 }
 0xb1c   :  { %v1435_v15 = vpop.f32.mrb[9].mxu1  ;;  %v1476_v16 = vpop.f32.mrb[9].mxu0  ;;  %v1434_v26 = vadd.f32 %v1433_v13, %v933_v47  ;;  %v1475_v34 = vadd.f32 %v1474_v14, %v941_v48 }
 0xb1d   :  { %v1436_v40 = vadd.f32 %v1435_v15, %v937_v8  ;;  %v1477_v17 = vadd.f32 %v1476_v16, %v945_v1  ;;  %v1437_v11 = vpop.f32.mrb[10].mxu1  ;;  %v1478_v42 = vpop.f32.mrb[10].mxu0  ;;  %3101 = vmatpush3.bf16.msra.mxu1 %v3383_v31  ;;  %3123 = vmatpush3.bf16.msra.mxu0 %v3384_v9  ;;  %v3405_v1 = vld [vmem:[#allocation8 + $0x240] sm:$0xff]  }
 0xb1e   :  { %v1438_v20 = vpop.f32.mrb[11].mxu1  ;;  %v1479_v21 = vpop.f32.mrb[11].mxu0  ;;  %3102 = vmatprep.subr.bf16.mxu1 %v3385_v10  ;;  %3124 = vmatprep.subr.bf16.mxu0 %v3386_v12  ;;  %v1649_v2 = vmax.f32 %v1434_v26, 0.0  ;;  %v1651_v5 = vmax.f32 %v1475_v34, 0.0  ;;  %v3406_v31 = vld [vmem:[#allocation8 + $0x2c0] sm:$0xff]   ;;  %v3411_v42 = vld [vmem:[#allocation8 + $0x208] sm:$0xff]   ;;  %v949_v26 = vrot.slane %v3977_v28, %v3901_v35 }
 0xb1f   :  { %v1650_v25 = vmax.f32 %v1436_v40, 0.0  ;;  %v1652_v37 = vmax.f32 %v1477_v17, 0.0  ;;  %v3407_v12 = vld [vmem:[#allocation8 + $0x200] sm:$0xff]   ;;  %v3409_v40 = vld [vmem:[#allocation8 + $0x248] sm:$0xff]   ;;  %v3414_v20 = vld [vmem:[#allocation8 + $0x2d0] sm:$0xff]   ;;  %v965_v21 = vrot.slane %v3977_v28, %v932_v41 }
 0xb20   :  { %v1665_v13 = vpack.c.bf16 %v1649_v2, %v1649_v2  ;;  %v1667_v14 = vpack.c.bf16 %v1651_v5, %v1651_v5  ;;  %v3408_v15 = vld [vmem:[#allocation8 + $0x280] sm:$0xff]   ;;  %v3410_v17 = vld [vmem:[#allocation8 + $0x2c8] sm:$0xff]   ;;  %v3419_v41 = vld [vmem:[#allocation8 + $0x218] sm:$0xff]  }
 0xb21   :  { %v1666_v38 = vpack.c.bf16 %v1650_v25, %v1650_v25  ;;  %v1668_v39 = vpack.c.bf16 %v1652_v37, %v1652_v37  ;;  %3103 = vmatpush3.bf16.msra.mxu1 %v3387_v18  ;;  %3125 = vmatpush3.bf16.msra.mxu0 %v3388_v19  ;;  %v3412_v18 = vld [vmem:[#allocation8 + $0x288] sm:$0xff]   ;;  %v3413_v19 = vld [vmem:[#allocation8 + $0x250] sm:$0xff]   ;;  %v3417_v25 = vld [vmem:[#allocation8 + $0x258] sm:$0xff]  }
 0xb22   :  { %3104 = vmatprep.subr.bf16.mxu1 %v3389_v22  ;;  %3126 = vmatprep.subr.bf16.mxu0 %v3390_v24  ;;  %v3415_v22 = vld [vmem:[#allocation8 + $0x210] sm:$0xff]   ;;  %v3428_v34 = vld [vmem:[#allocation8 + $0x2a8] sm:$0xff]  }
 0xb23   :  { %2563 = vmatprep.mubr.bf16.mxu1 %v1666_v38  ;;  %2603 = vmatprep.mubr.bf16.mxu0 %v1668_v39  ;;  %v3416_v24 = vld [vmem:[#allocation8 + $0x290] sm:$0xff]   ;;  %v3418_v39 = vld [vmem:[#allocation8 + $0x2d8] sm:$0xff]  }
 0xb24   :  { %v3432_v35 = vld [vmem:[#allocation8 + $0x2b0] sm:$0xff]  }
 0xb25   :  { %3105 = vmatpush3.bf16.msra.mxu1 %v3391_v29  ;;  %3127 = vmatpush3.bf16.msra.mxu0 %v3392_v33 }
 0xb26   :  { %3106 = vmatprep.subr.bf16.mxu1 %v3393_v43  ;;  %3128 = vmatprep.subr.bf16.mxu0 %v3394_v44 }
 0xb29   :  { %3107 = vmatpush3.bf16.msra.mxu1 %v3395_v45  ;;  %3129 = vmatpush3.bf16.msra.mxu0 %v3396_v46 }
 0xb2a   :  { %3108 = vmatprep.subr.bf16.mxu1 %v3397_v53  ;;  %3130 = vmatprep.subr.bf16.mxu0 %v3398_v49  ;;  %v3420_v53 = vld [vmem:[#allocation8 + $0x298] sm:$0xff]   ;;  %v3421_v49 = vld [vmem:[#allocation8 + $0x260] sm:$0xff]  }
 0xb2b   :  { %v4024_v23 = vpop.f32.mrb[12].mxu1  ;;  %v1556_v7 = vpop.f32.mrb[12].mxu0 }
 0xb2c   :  { %v4026_v59 = vadd.f32 %v1556_v7, %v957_v50  ;;  %v1517_v30 = vpop.f32.mrb[13].mxu1  ;;  %v1558_v0 = vpop.f32.mrb[13].mxu0  ;;  %v3422_v50 = vld [vmem:[#allocation8 + $0x2e0] sm:$0xff]   ;;  %v969_v7 = vrot.slane %v3977_v28, %v936_v3 }
 0xb2d   :  { %v1518_v56 = vadd.f32 %v1517_v30, %v953_v51  ;;  %v1559_v60 = vadd.f32 %v1558_v0, %v961_v52  ;;  %v1519_v61 = vpop.f32.mrb[14].mxu1  ;;  %v1560_v62 = vpop.f32.mrb[14].mxu0  ;;  %3109 = vmatpush3.bf16.msra.mxu1 %v3399_v54  ;;  %3131 = vmatpush3.bf16.msra.mxu0 %v3400_v55  ;;  %v3423_v51 = vld [vmem:[#allocation8 + $0x220] sm:$0xff]   ;;  %v3425_v52 = vld [vmem:[#allocation8 + $0x268] sm:$0xff]   ;;  %v977_v30 = vrot.slane %v3977_v28, %v944_v4  ;;  %v3431_v0 = vld [vmem:[#allocation8 + $0x230] sm:$0xff]  }
 0xb2e   :  { %v1520_v6 = vpop.f32.mrb[15].mxu1  ;;  %v1561_v8 = vpop.f32.mrb[15].mxu0  ;;  %3110 = vmatprep.subr.bf16.mxu1 %v3401_v57  ;;  %3132 = vmatprep.subr.bf16.mxu0 %v3402_v58  ;;  %v3426_v54 = vld [vmem:[#allocation8 + $0x2e8] sm:$0xff]   ;;  %v3429_v57 = vld [vmem:[#allocation8 + $0x270] sm:$0xff]   ;;  %v3434_v61 = vld [vmem:[#allocation8 + $0x2f8] sm:$0xff]   ;;  %v1655_v28 = vmax.f32 %v4026_v59, 0.0 }
 0xb2f   :  { %v1654_v9 = vmax.f32 %v1518_v56, 0.0  ;;  %v1656_v10 = vmax.f32 %v1559_v60, 0.0  ;;  %v3427_v55 = vld [vmem:[#allocation8 + $0x228] sm:$0xff]   ;;  %v3430_v58 = vld [vmem:[#allocation8 + $0x2f0] sm:$0xff]   ;;  %v1516_v56 = vadd.f32 %v4024_v23, %v949_v26  ;;  %v3433_v60 = vld [vmem:[#allocation8 + $0x278] sm:$0xff]  }
 0xb30   :  { %v3437_v3 = vld [vmem:[#allocation8 + $0x340] sm:$0xff]   ;;  %v3443_v59 = vld [vmem:[#allocation8 + $0x308] sm:$0xff]  }
 0xb31   :  { %3111 = vmatpush3.bf16.msra.mxu1 %v3403_v36  ;;  %3133 = vmatpush3.bf16.msra.mxu0 %v3404_v63  ;;  %v1670_v16 = vpack.c.bf16 %v1654_v9, %v1654_v9  ;;  %v1672_v11 = vpack.c.bf16 %v1656_v10, %v1656_v10  ;;  %v3435_v63 = vld [vmem:[#allocation8 + $0x238] sm:$0xff]   ;;  %v1653_v2 = vmax.f32 %v1516_v56, 0.0  ;;  %v3438_v4 = vld [vmem:[#allocation8 + $0x3c0] sm:$0xff]   ;;  %v3441_v9 = vld [vmem:[#allocation8 + $0x348] sm:$0xff]  }
 0xb32   :  { %3140 = vmatprep.subr.bf16.mxu1 %v3405_v1  ;;  %3162 = vmatprep.subr.bf16.mxu0 %v3406_v31  ;;  %v3439_v6 = vld [vmem:[#allocation8 + $0x300] sm:$0xff]   ;;  %v1671_v31 = vpack.c.bf16 %v1655_v28, %v1655_v28 }
 0xb33   :  { %v1669_v8 = vpack.c.bf16 %v1653_v2, %v1653_v2  ;;  %v3440_v1 = vld [vmem:[#allocation8 + $0x380] sm:$0xff]  }
 0xb34   :  { %2564 = vmatmul.mubr.bf16.vlgmr.msra.gmra.mrb[24].mxu1 %v1665_v13  ;;  %2604 = vmatmul.mubr.bf16.vlgmr.msra.gmra.mrb[24].mxu0 %v1667_v14  ;;  %v3444_v14 = vld [vmem:[#allocation8 + $0x388] sm:$0xff]  }
 0xb35   :  { %3141 = vmatpush3.bf16.msra.mxu1 %v3407_v12  ;;  %2643 = vmatprep.mubr.bf16.mxu1 %v1670_v16  ;;  %v3442_v12 = vld [vmem:[#allocation8 + $0x3c8] sm:$0xff]   ;;  %v3446_v16 = vld [vmem:[#allocation8 + $0x3d0] sm:$0xff]  }
 0xb36   :  { %3163 = vmatpush3.bf16.msra.mxu0 %v3408_v15  ;;  %2683 = vmatprep.mubr.bf16.mxu0 %v1672_v11  ;;  %v3445_v15 = vld [vmem:[#allocation8 + $0x350] sm:$0xff]   ;;  %v3449_v11 = vld [vmem:[#allocation8 + $0x358] sm:$0xff]  }
 0xb37   :  { %3142 = vmatprep.subr.bf16.mxu1 %v3409_v40  ;;  %3164 = vmatprep.subr.bf16.mxu0 %v3410_v17  ;;  %v3447_v40 = vld [vmem:[#allocation8 + $0x310] sm:$0xff]  }
 0xb38   :  { %v3448_v17 = vld [vmem:[#allocation8 + $0x390] sm:$0xff]  }
 0xb39   :  { %3143 = vmatpush3.bf16.msra.mxu1 %v3411_v42  ;;  %v3450_v42 = vld [vmem:[#allocation8 + $0x3d8] sm:$0xff]  }
 0xb3a   :  { %3165 = vmatpush3.bf16.msra.mxu0 %v3412_v18  ;;  %3144 = vmatprep.subr.bf16.mxu1 %v3413_v19  ;;  %v3451_v18 = vld [vmem:[#allocation8 + $0x318] sm:$0xff]  }
 0xb3b   :  { %v1597_v37 = vpop.f32.mrb[16].mxu1  ;;  %v1638_v38 = vpop.f32.mrb[16].mxu0  ;;  %3166 = vmatprep.subr.bf16.mxu0 %v3414_v20  ;;  %v3452_v19 = vld [vmem:[#allocation8 + $0x398] sm:$0xff]   ;;  %v3453_v20 = vld [vmem:[#allocation8 + $0x360] sm:$0xff]  }
 0xb3c   :  { %v4031_v29 = vadd.f32 %v1597_v37, %v965_v21  ;;  %v4034_v33 = vadd.f32 %v1638_v38, %v3982_v32  ;;  %v1599_v43 = vpop.f32.mrb[17].mxu1  ;;  %v1640_v44 = vpop.f32.mrb[17].mxu0  ;;  %v3424_v32 = vld [vmem:[#allocation8 + $0x2a0] sm:$0xff]   ;;  %v3458_v37 = vld [vmem:[#allocation8 + $0x3e8] sm:$0xff]  }
 0xb3d   :  { %v1601_v45 = vpop.f32.mrb[18].mxu1  ;;  %v1642_v46 = vpop.f32.mrb[18].mxu0  ;;  %3145 = vmatpush3.bf16.msra.mxu1 %v3415_v22  ;;  %v1600_v62 = vadd.f32 %v1599_v43, %v969_v7  ;;  %v1641_v36 = vadd.f32 %v1640_v44, %v977_v30  ;;  %v3454_v21 = vld [vmem:[#allocation8 + $0x3e0] sm:$0xff]   ;;  %v3459_v38 = vld [vmem:[#allocation8 + $0x328] sm:$0xff]   ;;  %v3461_v43 = vld [vmem:[#allocation8 + $0x370] sm:$0xff]  }
 0xb3e   :  { %3167 = vmatpush3.bf16.msra.mxu0 %v3416_v24  ;;  %v1602_v47 = vpop.f32.mrb[19].mxu1  ;;  %v1643_v48 = vpop.f32.mrb[19].mxu0  ;;  %3146 = vmatprep.subr.bf16.mxu1 %v3417_v25  ;;  %v3455_v22 = vld [vmem:[#allocation8 + $0x320] sm:$0xff]   ;;  %v3457_v25 = vld [vmem:[#allocation8 + $0x368] sm:$0xff]   ;;  %v3462_v44 = vld [vmem:[#allocation8 + $0x3f0] sm:$0xff]  }
 0xb3f   :  { %3168 = vmatprep.subr.bf16.mxu0 %v3418_v39  ;;  %v1658_v23 = vmax.f32 %v1600_v62, 0.0  ;;  %v1660_v5 = vmax.f32 %v1641_v36, 0.0  ;;  %v3456_v24 = vld [vmem:[#allocation8 + $0x3a0] sm:$0xff]   ;;  %v3460_v39 = vld [vmem:[#allocation8 + $0x3a8] sm:$0xff]   ;;  %v3463_v45 = vld [vmem:[#allocation8 + $0x330] sm:$0xff]  }
 0xb40   :  { %v3464_v46 = vld [vmem:[#allocation8 + $0x3b0] sm:$0xff]   ;;  %v3466_v47 = vld [vmem:[#allocation8 + $0x3f8] sm:$0xff]  }
 0xb41   :  { %3147 = vmatpush3.bf16.msra.mxu1 %v3419_v41  ;;  %v1674_v10 = vpack.c.bf16 %v1658_v23, %v1658_v23  ;;  %v1676_v13 = vpack.c.bf16 %v1660_v5, %v1660_v5  ;;  %v3465_v41 = vld [vmem:[#allocation8 + $0x378] sm:$0xff]  }
 0xb42   :  { %3169 = vmatpush3.bf16.msra.mxu0 %v3420_v53  ;;  %3148 = vmatprep.subr.bf16.mxu1 %v3421_v49  ;;  %v3467_v48 = vld [vmem:[#allocation8 + $0x338] sm:$0xff]   ;;  %v1657_v53 = vmax.f32 %v4031_v29, 0.0 }
 0xb43   :  { %3170 = vmatprep.subr.bf16.mxu0 %v3422_v50  ;;  %v3468_v49 = vld [vmem:[#allocation8 + $0x3b8] sm:$0xff]   ;;  %v1659_v50 = vmax.f32 %v4034_v33, 0.0 }
 0xb45   :  { %3149 = vmatpush3.bf16.msra.mxu1 %v3423_v51  ;;  %v1673_v51 = vpack.c.bf16 %v1657_v53, %v1657_v53 }
 0xb46   :  { %3171 = vmatpush3.bf16.msra.mxu0 %v3424_v32  ;;  %3150 = vmatprep.subr.bf16.mxu1 %v3425_v52  ;;  %v1675_v32 = vpack.c.bf16 %v1659_v50, %v1659_v50 }
 0xb47   :  { %3172 = vmatprep.subr.bf16.mxu0 %v3426_v54 }
 0xb49   :  { %3151 = vmatpush3.bf16.msra.mxu1 %v3427_v55 }
 0xb4a   :  { %3173 = vmatpush3.bf16.msra.mxu0 %v3428_v34  ;;  %3152 = vmatprep.subr.bf16.mxu1 %v3429_v57 }
 0xb4b   :  { %3174 = vmatprep.subr.bf16.mxu0 %v3430_v58 }
 0xb4d   :  { %3153 = vmatpush3.bf16.msra.mxu1 %v3431_v0 }
 0xb4e   :  { %3175 = vmatpush3.bf16.msra.mxu0 %v3432_v35  ;;  %3154 = vmatprep.subr.bf16.mxu1 %v3433_v60 }
 0xb4f   :  { %3176 = vmatprep.subr.bf16.mxu0 %v3434_v61 }
 0xb51   :  { %3155 = vmatpush3.bf16.msra.mxu1 %v3435_v63 }
 0xb52   :  { %3177 = vmatpush3.bf16.msra.mxu0 %v3436_v27  ;;  %3184 = vmatprep.subr.bf16.mxu1 %v3437_v3 }
 0xb53   :  { %3206 = vmatprep.subr.bf16.mxu0 %v3438_v4 }
 0xb54   :  { %2644 = vmatmul.mubr.bf16.vlgmr.msra.gmra.mrb[28].mxu1 %v1669_v8 }
 0xb55   :  { %2684 = vmatmul.mubr.bf16.vlgmr.msra.gmra.mrb[28].mxu0 %v1671_v31  ;;  %3185 = vmatpush3.bf16.msra.mxu1 %v3439_v6 }
 0xb56   :  { %2723 = vmatprep.mubr.bf16.mxu1 %v1674_v10  ;;  %3207 = vmatpush3.bf16.msra.mxu0 %v3440_v1 }
 0xb57   :  { %2763 = vmatprep.mubr.bf16.mxu0 %v1676_v13  ;;  %3186 = vmatprep.subr.bf16.mxu1 %v3441_v9 }
 0xb58   :  { %3208 = vmatprep.subr.bf16.mxu0 %v3442_v12 }
 0xb59   :  { %3187 = vmatpush3.bf16.msra.mxu1 %v3443_v59 }
 0xb5a   :  { %3209 = vmatpush3.bf16.msra.mxu0 %v3444_v14  ;;  %3188 = vmatprep.subr.bf16.mxu1 %v3445_v15 }
 0xb5b   :  { %3210 = vmatprep.subr.bf16.mxu0 %v3446_v16 }
 0xb5d   :  { %3189 = vmatpush3.bf16.msra.mxu1 %v3447_v40 }
 0xb5e   :  { %3211 = vmatpush3.bf16.msra.mxu0 %v3448_v17  ;;  %3190 = vmatprep.subr.bf16.mxu1 %v3449_v11 }
 0xb5f   :  { %3212 = vmatprep.subr.bf16.mxu0 %v3450_v42 }
 0xb61   :  { %3191 = vmatpush3.bf16.msra.mxu1 %v3451_v18 }
 0xb62   :  { %3213 = vmatpush3.bf16.msra.mxu0 %v3452_v19  ;;  %3192 = vmatprep.subr.bf16.mxu1 %v3453_v20 }
 0xb63   :  { %3214 = vmatprep.subr.bf16.mxu0 %v3454_v21 }
 0xb65   :  { %3193 = vmatpush3.bf16.msra.mxu1 %v3455_v22 }
 0xb66   :  { %3215 = vmatpush3.bf16.msra.mxu0 %v3456_v24  ;;  %3194 = vmatprep.subr.bf16.mxu1 %v3457_v25 }
 0xb67   :  { %3216 = vmatprep.subr.bf16.mxu0 %v3458_v37 }
 0xb69   :  { %3195 = vmatpush3.bf16.msra.mxu1 %v3459_v38 }
 0xb6a   :  { %3217 = vmatpush3.bf16.msra.mxu0 %v3460_v39  ;;  %3196 = vmatprep.subr.bf16.mxu1 %v3461_v43 }
 0xb6b   :  { %3218 = vmatprep.subr.bf16.mxu0 %v3462_v44 }
 0xb6d   :  { %3197 = vmatpush3.bf16.msra.mxu1 %v3463_v45 }
 0xb6e   :  { %3219 = vmatpush3.bf16.msra.mxu0 %v3464_v46  ;;  %3198 = vmatprep.subr.bf16.mxu1 %v3465_v41 }
 0xb6f   :  { %3220 = vmatprep.subr.bf16.mxu0 %v3466_v47 }
 0xb71   :  { %3199 = vmatpush3.bf16.msra.mxu1 %v3467_v48 }
 0xb72   :  { %3221 = vmatpush3.bf16.msra.mxu0 %v3468_v49 }
 0xb74   :  { %2724 = vmatmul.mubr.bf16.vlgmr.msra.gmra.mrb[32].mxu1 %v1673_v51 }
 0xb75   :  { %2764 = vmatmul.mubr.bf16.vlgmr.msra.gmra.mrb[32].mxu0 %v1675_v32 }
 0xb76   :  { %3592 = shalt.err (!%p3589_p8)
}
 0xb77   :  { %s3593_s1 = scalar_lea.hbm %s4088_s13, 32 }
 0xb78   :  { %p3594_p9 = scmp.ne.s32.totalorder %s4088_s13, %s3593_s1  ;;  %p3597_p10 = scmp.lt.u32.totalorder %s3593_s1, %s4088_s13 }
 0xb7a   :  { %p3599_p11 = pnand %p3597_p10, %p3594_p9 }
 0xb7c   :  { %3602 = shalt.err (!%p3599_p11)
}
 0xb7d   :  { %2804 = dma.vmem_to_hbm [thread:$0]  %s2802_s24, 32, %s4088_s13, [#allocation12]   ;;  %v2896_v52 = vld [vmem:[%s4086_s11] ss:$0 sm:$0xff] }
 0xb7e   :  { %s3652_s11 = smov [#allocation10]  }
 0xb7f   :  { %s2791_s13 = sshll.u32 %s3652_s11, 4  ;;  %s2792_s13 = int_to_ptr.vmem [resolvable:$true] %s2791_s13 }
 0xb80   :  { %s3603_s17 = scalar_lea.vmem %s2792_s13, 32  ;;  %p3608_p13 = scmp.lt.s32.totalorder %s2792_s13, %s2792_s13 }
 0xb81   :  { %p3604_p12 = scmp.ne.s32.totalorder %s2792_s13, %s3603_s17  ;;  %p3609_p0 = scmp.lt.s32.totalorder %s3603_s17, %s3603_s17 }
 0xb83   :  { %p3610_p1 = por %p3609_p0, %p3608_p13 }
 0xb85   :  { %p3611_p2 = pnand %p3610_p1, %p3604_p12 }
 0xbe7   :  { %v3068_v29 = vpop.f32.mrb[20].mxu1  ;;  %v3090_v33 = vpop.f32.mrb[20].mxu0 }
 0xbe8   :  { %v3069_v54 = vpop.f32.mrb[21].mxu1  ;;  %v3091_v55 = vpop.f32.mrb[21].mxu0 }
 0xbe9   :  { %v3070_v26 = vadd.f32 %v3069_v54, %v3068_v29  ;;  %v3092_v34 = vadd.f32 %v3091_v55, %v3090_v33  ;;  %v3071_v57 = vpop.f32.mrb[22].mxu1  ;;  %v3093_v58 = vpop.f32.mrb[22].mxu0 }
 0xbea   :  { %v3072_v7 = vpop.f32.mrb[23].mxu1  ;;  %v3094_v30 = vpop.f32.mrb[23].mxu0 }
 0xbeb   :  { %v2486_v0 = vadd.f32 %v3070_v26, %v2896_v52 }
 0xbed   :  { %v2526_v56 = vadd.f32 %v3092_v34, %v2486_v0 }
 0xc07   :  { %v3112_v35 = vpop.f32.mrb[24].mxu1  ;;  %v3134_v60 = vpop.f32.mrb[24].mxu0 }
 0xc08   :  { %v3113_v61 = vpop.f32.mrb[25].mxu1  ;;  %v3135_v62 = vpop.f32.mrb[25].mxu0 }
 0xc09   :  { %v3114_v36 = vadd.f32 %v3113_v61, %v3112_v35  ;;  %v3136_v63 = vadd.f32 %v3135_v62, %v3134_v60  ;;  %v3115_v2 = vpop.f32.mrb[26].mxu1  ;;  %v3137_v27 = vpop.f32.mrb[26].mxu0 }
 0xc0a   :  { %v3116_v3 = vpop.f32.mrb[27].mxu1  ;;  %v3138_v28 = vpop.f32.mrb[27].mxu0 }
 0xc0b   :  { %v2566_v4 = vadd.f32 %v3114_v36, %v2526_v56 }
 0xc0d   :  { %v2606_v23 = vadd.f32 %v3136_v63, %v2566_v4 }
 0xc27   :  { %v3156_v5 = vpop.f32.mrb[28].mxu1 }
 0xc28   :  { %v3178_v6 = vpop.f32.mrb[28].mxu0  ;;  %v3157_v8 = vpop.f32.mrb[29].mxu1 }
 0xc29   :  { %v3158_v1 = vadd.f32 %v3157_v8, %v3156_v5  ;;  %v3179_v31 = vpop.f32.mrb[29].mxu0  ;;  %v3159_v9 = vpop.f32.mrb[30].mxu1 }
 0xc2a   :  { %v3180_v10 = vadd.f32 %v3179_v31, %v3178_v6  ;;  %v3181_v12 = vpop.f32.mrb[30].mxu0  ;;  %v3160_v13 = vpop.f32.mrb[31].mxu1 }
 0xc2b   :  { %v2646_v59 = vadd.f32 %v3158_v1, %v2606_v23  ;;  %v3182_v14 = vpop.f32.mrb[31].mxu0 }
 0xc2d   :  { %v2686_v15 = vadd.f32 %v3180_v10, %v2646_v59 }
 0xc47   :  { %v3200_v16 = vpop.f32.mrb[32].mxu1 }
 0xc48   :  { %v3222_v40 = vpop.f32.mrb[32].mxu0  ;;  %v3201_v17 = vpop.f32.mrb[33].mxu1 }
 0xc49   :  { %v3202_v11 = vadd.f32 %v3201_v17, %v3200_v16  ;;  %v3223_v42 = vpop.f32.mrb[33].mxu0  ;;  %v3203_v18 = vpop.f32.mrb[34].mxu1 }
 0xc4a   :  { %v3224_v19 = vadd.f32 %v3223_v42, %v3222_v40  ;;  %v3225_v20 = vpop.f32.mrb[34].mxu0  ;;  %v3204_v21 = vpop.f32.mrb[35].mxu1 }
 0xc4b   :  { %v2726_v22 = vadd.f32 %v3202_v11, %v2686_v15  ;;  %v3226_v24 = vpop.f32.mrb[35].mxu0 }
 0xc4d   :  { %v2766_v25 = vadd.f32 %v3224_v19, %v2726_v22 }
 0xc4f   :  { %2771 = vst [vmem:[#allocation10] sm:$0x3] %v2766_v25 }
 0xc50   :  { %3614 = shalt.err (!%p3611_p2)
}
 0xc51   :  { %s3615_s4 = scalar_lea.hbm %s4087_s12, 32 }
 0xc52   :  { %p3616_p3 = scmp.ne.s32.totalorder %s4087_s12, %s3615_s4  ;;  %p3619_p4 = scmp.lt.u32.totalorder %s3615_s4, %s4087_s12 }
 0xc54   :  { %p3621_p5 = pnand %p3619_p4, %p3616_p3 }
 0xc56   :  { %3624 = shalt.err (!%p3621_p5)
}
 0xc57   :  { %2794 = dma.vmem_to_hbm [thread:$0]  %s2792_s13, 32, %s4087_s12, [#allocation4]  }
 0xc58   :  { %3631 = dma.done.wait [#allocation4], 32  }
 0xc59   :  { %3632 = vsyncadd [#allocation4], 4294967264 }
 0xc5a   :  { %3633 = dma.done.wait [#allocation12], 32  }
 0xc5b   :  { %3634 = vsyncadd [#allocation12], 4294967264 }
 0xc5c   :  { %2811 = vsyncpa [#allocation3], 1 }
 0xc5d   :  { %2812 = vsyncpa [#allocation6], 1 }
 0xc5e   :  { %2813 = vsyncpa [#allocation9], 1 }
 0xc5f   :  { %2814 = vsyncpa [#allocation4], 1 }
 0xc60   :  { %2815 = vsyncpa [#allocation12], 1 }

</bundles_post_ra>
